<compile_context>
chip_gen: v7x
topology: tpu7x:2x2x1
jax: 0.10.0
libtpu: 0.0.40
codegen_flags: <defaults>
</compile_context>

<pallas_src>
import re
import numpy as np
import jax
import jax.numpy as jnp
from jax import lax
from jax.experimental import pallas as pl
from jax.experimental.pallas import tpu as pltpu


# ----------------------------------------------------------------------------
# Hardware queries (VMEM capacity, bf16-streaming decision)
# ----------------------------------------------------------------------------
def _tpu_generation():
    try:
        kind = jax.devices()[0].device_kind.lower()
    except Exception:
        return 0
    m = re.search(r"(\d+)", kind)
    return int(m.group(1)) if m else 0


def _tpu_vmem_bytes():
    try:
        return int(pltpu.get_tpu_info().vmem_capacity_bytes)
    except Exception:
        gen = _tpu_generation()
        if gen in (5, 6):
            return 128 * 1024 * 1024
        return 64 * 1024 * 1024       # v7x has 64 MiB; safe default when unknown


def _default_stream_dtype():
    # bf16 streaming of the big kernel-1 inputs on v6e/v7x (both kernels are
    # HBM-bandwidth-bound); f32 on v5e and older / unknown parts.
    return jnp.bfloat16 if _tpu_generation() >= 6 else jnp.float32


def _compiler_params(dims, vmem_bytes):
    # Hardware-aware cap: ~75% of physical VMEM (48 MiB on v7x, 96 MiB on
    # v5e/v6e) never exceeds the part and leaves compiler scratch headroom.
    return pltpu.CompilerParams(dimension_semantics=dims,
                                vmem_limit_bytes=int(vmem_bytes * 3 // 4))


# ----------------------------------------------------------------------------
# Kernel 1: g1 = W_g(g); x1 = maxpool(W_x(x)); psi = relu(g1+x1);
#           a = sigmoid(psi_conv(psi))          (per-voxel matmuls)
# ----------------------------------------------------------------------------
def _attn_coef_kernel(g_ref, xc_ref, wg_ref, bg_ref, wx_ref, bx_ref,
                      wpsi_ref, bpsi_ref, o_ref):
    wx = wx_ref[...]
    g1 = jnp.dot(g_ref[...], wg_ref[...],
                 preferred_element_type=jnp.float32) + bg_ref[...]        # (TV, Fi)

    # MaxPool3d(2) fused with the folded W_x conv: one small matmul per corner
    # plus a running VPU max (8x smaller live temporary than one fused matmul).
    x1 = jnp.dot(xc_ref[0], wx, preferred_element_type=jnp.float32)
    for c in range(1, 8):
        x1 = jnp.maximum(x1, jnp.dot(xc_ref[c], wx,
                                     preferred_element_type=jnp.float32))

    psi = jnp.maximum(g1 + x1 + bx_ref[...], 0.0)                         # (TV, Fi)

    # psi 1x1x1 conv (output width 1) off the MXU: VPU multiply + lane reduce.
    logits = jnp.sum(psi * wpsi_ref[...], axis=-1, keepdims=True) + bpsi_ref[...]

    # Numerically stable sigmoid on the EUP tanh path.
    a_vals = 0.5 + 0.5 * jnp.tanh(0.5 * logits)                           # (TV, 1)
    # Lane-dense store: relayout the tiny (TV, 1) column to a (1, TV) row.
    o_ref[0] = jnp.transpose(a_vals)


# ----------------------------------------------------------------------------
# Kernel 2: trilinear 2x upsample of a (align_corners=False), per batch
#           element.  Outputs the even / odd depth-parity planes separately
#           (they are interleaved into the 2D axis by a tiny glue stack).
# ----------------------------------------------------------------------------
def _alpha_upsample_kernel(a_ref, uh_ref, uwt_ref, oe_ref, oo_ref):
    D, H, W = a_ref.shape[1:]
    H2 = uh_ref.shape[0]
    W2 = uwt_ref.shape[1]
    a = a_ref[0]                                                   # (D, H, W)

    # W axis: batched over D, contract W with Uw^T (W, 2W) -> (D, H, 2W)
    b = lax.dot_general(a, jnp.broadcast_to(uwt_ref[...], (D, W, W2)),
                        dimension_numbers=(((2,), (1,)), ((0,), (0,))),
                        preferred_element_type=jnp.float32)
    # H axis: batched over D, (2H, H) @ (H, 2W) -> (D, 2H, 2W)
    b = lax.dot_general(jnp.broadcast_to(uh_ref[...], (D, H2, H)), b,
                        dimension_numbers=(((2,), (1,)), ((0,), (0,))),
                        preferred_element_type=jnp.float32)

    # D axis: align_corners=False 2x upsample == parity neighbour blend with
    # edge replication (identical weights to the 1-D upsample matrix).
    if D > 1:
        nb_lo = jnp.concatenate([b[:1], b[:-1]], axis=0)           # b[k-1] clamped
        nb_hi = jnp.concatenate([b[1:], b[-1:]], axis=0)           # b[k+1] clamped
    else:
        nb_lo = nb_hi = b
    oe_ref[0] = 0.75 * b + 0.25 * nb_lo                            # depth 2k
    oo_ref[0] = 0.75 * b + 0.25 * nb_hi                            # depth 2k+1


# ----------------------------------------------------------------------------
# Kernel 3: pure streamed gating multiply, y = x * alpha, in native NCDHW
#           layout (x viewed as (N, Fl, 2D, 4HW); alpha broadcast over Fl).
# ----------------------------------------------------------------------------
def _gate_kernel(x_ref, a_ref, o_ref):
    o_ref[...] = x_ref[...] * a_ref[...][:, None, :, :]


# ----------------------------------------------------------------------------
# Tiling helpers
# ----------------------------------------------------------------------------
def _pick_voxel_tile(M, row_bytes, budget, cap):
    """Largest multiple-of-128 voxel tile that divides M and fits the budget."""
    cap = int(min(cap, max(128, (budget // max(row_bytes, 1)) // 128 * 128)))
    for tv in range(cap, 127, -128):
        if M % tv == 0:
            return tv, M
    mp = -(-M // 128) * 128
    for tv in range(cap, 127, -128):
        if mp % tv == 0:
            return tv, mp
    return 128, mp


def _pick_gate_tiles(Fl, D2, S4, budget):
    """Channel / depth tiles for the gating kernel (TD must be full or 8k)."""
    td_cands = sorted({D2} | {t for t in range(8, D2, 8) if D2 % t == 0},
                      reverse=True)
    tf_cands = sorted({t for t in range(1, Fl + 1) if Fl % t == 0}, reverse=True)
    best, best_sz = (tf_cands[-1], td_cands[-1]), -1
    for td in td_cands:
        for tf in tf_cands:
            need = 8 * td * S4 * (2 * tf + 1)        # x+out (f32, x2 buf) + alpha
            if need <= budget and tf * td > best_sz:
                best, best_sz = (tf, td), tf * td
    return best


def _upsample_matrix_1d(n_in):
    """(2n, n) row-stochastic matrix of torch Upsample(2x, align_corners=False)."""
    n_out = 2 * n_in
    src = jnp.maximum((jnp.arange(n_out, dtype=jnp.float32) + 0.5) * 0.5 - 0.5, 0.0)
    i0 = jnp.clip(jnp.floor(src).astype(jnp.int32), 0, n_in - 1)
    i1 = jnp.clip(i0 + 1, 0, n_in - 1)
    lam = src - i0.astype(jnp.float32)
    return ((1.0 - lam)[:, None] * jax.nn.one_hot(i0, n_in, dtype=jnp.float32)
            + lam[:, None] * jax.nn.one_hot(i1, n_in, dtype=jnp.float32))


# ----------------------------------------------------------------------------
# Forward
# ----------------------------------------------------------------------------
def attention_block_forward(g, x, params, stream_dtype=None):
    """g: (N, F_g, D, H, W), x: (N, F_l, 2D, 2H, 2W)  ->  (N, F_l, 2D, 2H, 2W)."""
    N, Fg, D, H, W = g.shape
    Nx, Fl, Dx, Hx, Wx = x.shape
    assert Nx == N and (Dx, Hx, Wx) == (2 * D, 2 * H, 2 * W)
    Fi = params["wg"].shape[1]
    M = N * D * H * W

    vmem = _tpu_vmem_bytes()
    if stream_dtype is None:
        stream_dtype = _default_stream_dtype()
    sb = jnp.dtype(stream_dtype).itemsize

    # --- kernel-1 inputs: channels-last parity-corner view of x, g flattened;
    #     the transposes fuse with the (optional) bf16 downcast in XLA. -------
    xc = jnp.transpose(x.reshape(N, Fl, D, 2, H, 2, W, 2),
                       (3, 5, 7, 0, 2, 4, 6, 1)).reshape(8, M, Fl).astype(stream_dtype)
    g2d = jnp.transpose(g, (0, 2, 3, 4, 1)).reshape(M, Fg).astype(stream_dtype)
    wg = params["wg"].astype(stream_dtype)
    wx = params["wx"].astype(stream_dtype)

    # --------------------------- kernel 1 ---------------------------------
    # Row bytes include the double-buffered input streams AND the f32 matmul
    # temporaries (g1 / x1 / per-corner product / psi), per the v7x review.
    row_bytes = 2 * sb * (Fg + 8 * Fl) + 24 * Fi + 16
    cap = 4096 if vmem >= 96 * 1024 * 1024 else 2048
    TV, Mp = _pick_voxel_tile(M, row_bytes, budget=vmem // 4, cap=cap)
    if Mp != M:
        # TODO(synk): ragged path pads the corner view once more in HBM; only
        #             hit when N*D*H*W is not a multiple of 128.
        xc = jnp.pad(xc, ((0, 0), (0, Mp - M), (0, 0)))
        g2d = jnp.pad(g2d, ((0, Mp - M), (0, 0)))
    G = Mp // TV

    a_lanes = pl.pallas_call(
        _attn_coef_kernel,
        out_shape=jax.ShapeDtypeStruct((G, 1, TV), jnp.float32),
        grid=(G,),
        in_specs=[
            pl.BlockSpec((TV, Fg), lambda i: (i, 0)),
            pl.BlockSpec((8, TV, Fl), lambda i: (0, i, 0)),
            pl.BlockSpec((Fg, Fi), lambda i: (0, 0)),
            pl.BlockSpec((1, Fi), lambda i: (0, 0)),
            pl.BlockSpec((Fl, Fi), lambda i: (0, 0)),
            pl.BlockSpec((1, Fi), lambda i: (0, 0)),
            pl.BlockSpec((1, Fi), lambda i: (0, 0)),
            pl.BlockSpec((1, 1), lambda i: (0, 0)),
        ],
        out_specs=pl.BlockSpec((1, 1, TV), lambda i: (i, 0, 0)),
        compiler_params=_compiler_params(("parallel",), vmem),
    )(g2d, xc, wg, params["bg"], wx, params["bx"],
      params["wpsi"], params["bpsi"])
    a = a_lanes.reshape(Mp)[:M].reshape(N, D, H, W)

    # --------------------------- kernel 2 ---------------------------------
    D2, H2, W2 = 2 * D, 2 * H, 2 * W
    S4 = H2 * W2
    uh = _upsample_matrix_1d(H)                      # (2H, H)
    uwt = _upsample_matrix_1d(W).T                   # (W, 2W)

    if 140 * D * H * W <= vmem // 2:
        a_even, a_odd = pl.pallas_call(
            _alpha_upsample_kernel,
            out_shape=(jax.ShapeDtypeStruct((N, D, H2, W2), jnp.float32),
                       jax.ShapeDtypeStruct((N, D, H2, W2), jnp.float32)),
            grid=(N,),
            in_specs=[
                pl.BlockSpec((1, D, H, W), lambda n: (n, 0, 0, 0)),
                pl.BlockSpec((H2, H), lambda n: (0, 0)),
                pl.BlockSpec((W, W2), lambda n: (0, 0)),
            ],
            out_specs=(pl.BlockSpec((1, D, H2, W2), lambda n: (n, 0, 0, 0)),
                       pl.BlockSpec((1, D, H2, W2), lambda n: (n, 0, 0, 0))),
            compiler_params=_compiler_params(("parallel",), vmem),
        )(a, uh, uwt)
        # Interleave the depth parities (tiny: alpha is ~1/F_l of x's bytes).
        alpha3 = jnp.stack([a_even, a_odd], axis=2).reshape(N, D2, S4)
    else:
        # TODO(synk): tile the Pallas upsample over D for very large volumes;
        #             plain-XLA fallback keeps it correct in the meantime.
        ud = _upsample_matrix_1d(D)
        al = jnp.einsum("Dd,ndhw->nDhw", ud, a)
        al = jnp.einsum("Hh,ndhw->ndHw", uh, al)
        al = jnp.einsum("wW,ndhw->ndhW", uwt, al)
        alpha3 = al.reshape(N, D2, S4)

    # --------------------------- kernel 3 ---------------------------------
    # Pure streamed gating multiply in the native NCDHW layout through a
    # reshape-only view (no trailing permute, lane-dense 4HW last axis).
    x4 = x.reshape(N, Fl, D2, S4)
    TF, TD = _pick_gate_tiles(Fl, D2, S4, budget=vmem // 4)
    NF, ND = Fl // TF, D2 // TD

    y4 = pl.pallas_call(
        _gate_kernel,
        out_shape=jax.ShapeDtypeStruct((N, Fl, D2, S4), jnp.float32),
        grid=(N, ND, NF),   # channel tiles innermost -> alpha block re-used
        in_specs=[
            pl.BlockSpec((1, TF, TD, S4), lambda n, d, f: (n, f, d, 0)),
            pl.BlockSpec((1, TD, S4), lambda n, d, f: (n, d, 0)),
        ],
        out_specs=pl.BlockSpec((1, TF, TD, S4), lambda n, d, f: (n, f, d, 0)),
        compiler_params=_compiler_params(("parallel", "parallel", "arbitrary"),
                                         vmem),
    )(x4, alpha3)
    return y4.reshape(N, Fl, D2, H2, W2)


# ----------------------------------------------------------------------------
# Parameter setup (conv + eval-mode BatchNorm folded into (cin, cout) weights)
# ----------------------------------------------------------------------------
def init_params(key, F_g, F_l, F_int, eps=1e-5):
    def conv_bn_init(k, cin, cout):
        kw, kb, kg, kbe, km, kv = jax.random.split(k, 6)
        w = jax.random.normal(kw, (cout, cin), jnp.float32) / jnp.sqrt(float(cin))
        b = 0.1 * jax.random.normal(kb, (cout,), jnp.float32)
        gamma = 1.0 + 0.1 * jax.random.normal(kg, (cout,), jnp.float32)
        beta = 0.1 * jax.random.normal(kbe, (cout,), jnp.float32)
        mean = 0.1 * jax.random.normal(km, (cout,), jnp.float32)
        var = 0.5 + jax.random.uniform(kv, (cout,), jnp.float32)
        scale = gamma / jnp.sqrt(var + eps)
        w_eff = (w * scale[:, None]).T                 # (cin, cout) folded conv+BN
        b_eff = (b - mean) * scale + beta
        return (w, b, gamma, beta, mean, var), w_eff, b_eff

    kg_, kx_, kp_ = jax.random.split(key, 3)
    g_raw, wg, bg = conv_bn_init(kg_, F_g, F_int)
    x_raw, wx, bx = conv_bn_init(kx_, F_l, F_int)
    p_raw, wpsi, bpsi = conv_bn_init(kp_, F_int, 1)
    return {"wg": wg, "bg": bg.reshape(1, F_int),
            "wx": wx, "bx": bx.reshape(1, F_int),
            "wpsi": wpsi.reshape(1, F_int), "bpsi": bpsi.reshape(1, 1),
            "g_raw": g_raw, "x_raw": x_raw, "psi_raw": p_raw}


# ----------------------------------------------------------------------------
# Pure-JAX reference (same math as the PyTorch forward, eval-mode BN)
# ----------------------------------------------------------------------------
def reference_forward(g, x, p, eps=1e-5):
    hi = jax.lax.Precision.HIGHEST

    def conv_bn(t, raw):
        w, b, gamma, beta, mean, var = raw
        y = jnp.einsum("ncdhw,oc->nodhw", t, w, precision=hi)
        y = y + b[None, :, None, None, None]
        inv = (gamma / jnp.sqrt(var + eps))[None, :, None, None, None]
        return (y - mean[None, :, None, None, None]) * inv + beta[None, :, None, None, None]

    g1 = conv_bn(g, p["g_raw"])
    x1p = conv_bn(x, p["x_raw"])
    N, Fi, Dx, Hx, Wx = x1p.shape
    x1 = x1p.reshape(N, Fi, Dx // 2, 2, Hx // 2, 2, Wx // 2, 2).max(axis=(3, 5, 7))
    psi = jax.nn.relu(g1 + x1)
    pa = jax.nn.sigmoid(conv_bn(psi, p["psi_raw"]))                  # (N,1,D,H,W)
    Ud, Uh, Uw = (_upsample_matrix_1d(Dx // 2), _upsample_matrix_1d(Hx // 2),
                  _upsample_matrix_1d(Wx // 2))
    alpha = jnp.einsum("Dd,ncdhw->ncDhw", Ud, pa, precision=hi)
    alpha = jnp.einsum("Hh,ncdhw->ncdHw", Uh, alpha, precision=hi)
    alpha = jnp.einsum("Ww,ncdhw->ncdhW", Uw, alpha, precision=hi)
    return x * alpha


if __name__ == "__main__":
    N, F_g, F_l, F_int = 2, 8, 4, 8
    D = H = W = 4
    key = jax.random.PRNGKey(0)
    k1, k2, k3 = jax.random.split(key, 3)
    g = jax.random.normal(k1, (N, F_g, D, H, W), jnp.float32)
    x = jax.random.normal(k2, (N, F_l, 2 * D, 2 * H, 2 * W), jnp.float32)
    params = init_params(k3, F_g, F_l, F_int)

    sd = _default_stream_dtype()
    fwd = jax.jit(lambda gg, xx, pp: attention_block_forward(gg, xx, pp,
                                                             stream_dtype=sd))
    out = jax.block_until_ready(fwd(g, x, params))

    ref = jax.block_until_ready(reference_forward(g, x, params))
    tol = 2e-3 if jnp.dtype(sd) == jnp.dtype(jnp.float32) else 2e-2
    np.testing.assert_allclose(np.asarray(out), np.asarray(ref), rtol=tol, atol=tol)
    print("KERNEL_OK")
</pallas_src>

<mosaic_0001>
module attributes {stable_mosaic.version = 11 : i64} {
  func.func @_attn_coef_kernel(%arg0: i32, %arg1: memref<128x8xf32, #tpu.memory_space<vmem>>, %arg2: memref<8x128x4xf32, #tpu.memory_space<vmem>>, %arg3: memref<8x8xf32, #tpu.memory_space<vmem>>, %arg4: memref<1x8xf32, #tpu.memory_space<vmem>>, %arg5: memref<4x8xf32, #tpu.memory_space<vmem>>, %arg6: memref<1x8xf32, #tpu.memory_space<vmem>>, %arg7: memref<1x8xf32, #tpu.memory_space<vmem>>, %arg8: memref<1x1xf32, #tpu.memory_space<vmem>>, %arg9: memref<1x1x128xf32, #tpu.memory_space<vmem>>) attributes {dimension_semantics = [#tpu.dimension_semantics<parallel>], iteration_bounds = array<i64: 1>, scalar_prefetch = 0 : i64, scratch_operands = 0 : i64, tpu.core_type = #tpu.core_type<tc>, window_params = [{transform_indices = @transform_0, window_bounds = array<i64: 128, 8>}, {transform_indices = @transform_1, window_bounds = array<i64: 8, 128, 4>}, {pipeline_mode = #tpu.pipeline_mode<synchronous>, transform_indices = @transform_2, window_bounds = array<i64: 8, 8>}, {pipeline_mode = #tpu.pipeline_mode<synchronous>, transform_indices = @transform_3, window_bounds = array<i64: 1, 8>}, {pipeline_mode = #tpu.pipeline_mode<synchronous>, transform_indices = @transform_4, window_bounds = array<i64: 4, 8>}, {pipeline_mode = #tpu.pipeline_mode<synchronous>, transform_indices = @transform_5, window_bounds = array<i64: 1, 8>}, {pipeline_mode = #tpu.pipeline_mode<synchronous>, transform_indices = @transform_6, window_bounds = array<i64: 1, 8>}, {pipeline_mode = #tpu.pipeline_mode<synchronous>, transform_indices = @transform_7, window_bounds = array<i64: 1, 1>}, {transform_indices = @transform_8, window_bounds = array<i64: 1, 1, 128>}]} {
    %c0 = arith.constant 0 : index
    %c0_0 = arith.constant 0 : index
    %0 = vector.load %arg5[%c0, %c0_0] : memref<4x8xf32, #tpu.memory_space<vmem>>, vector<4x8xf32>
    %c0_1 = arith.constant 0 : index
    %c0_2 = arith.constant 0 : index
    %1 = vector.load %arg1[%c0_1, %c0_2] : memref<128x8xf32, #tpu.memory_space<vmem>>, vector<128x8xf32>
    %c0_3 = arith.constant 0 : index
    %c0_4 = arith.constant 0 : index
    %2 = vector.load %arg3[%c0_3, %c0_4] : memref<8x8xf32, #tpu.memory_space<vmem>>, vector<8x8xf32>
    %cst = arith.constant dense<0.000000e+00> : vector<128x8xf32>
    %3 = tpu.matmul %1, %2, %cst {dimension_numbers = #tpu.dot_dimension_numbers<[1], [0], [0], [1], [0, 0, 1, 1], [], []>} : vector<128x8xf32>, vector<8x8xf32>, vector<128x8xf32> -> vector<128x8xf32>
    %c0_5 = arith.constant 0 : index
    %c0_6 = arith.constant 0 : index
    %4 = vector.load %arg4[%c0_5, %c0_6] : memref<1x8xf32, #tpu.memory_space<vmem>>, vector<1x8xf32>
    %5 = vector.broadcast %4 : vector<1x8xf32> to vector<128x8xf32>
    %6 = arith.addf %3, %5 : vector<128x8xf32>
    %c0_7 = arith.constant 0 : index
    %c0_8 = arith.constant 0 : index
    %c0_9 = arith.constant 0 : index
    %7 = vector.load %arg2[%c0_7, %c0_8, %c0_9] : memref<8x128x4xf32, #tpu.memory_space<vmem>>, vector<1x128x4xf32>
    %8 = vector.shape_cast %7 : vector<1x128x4xf32> to vector<128x4xf32>
    %cst_10 = arith.constant dense<0.000000e+00> : vector<128x8xf32>
    %9 = tpu.matmul %8, %0, %cst_10 {dimension_numbers = #tpu.dot_dimension_numbers<[1], [0], [0], [1], [0, 0, 1, 1], [], []>} : vector<128x4xf32>, vector<4x8xf32>, vector<128x8xf32> -> vector<128x8xf32>
    %c1 = arith.constant 1 : index
    %c0_11 = arith.constant 0 : index
    %c0_12 = arith.constant 0 : index
    %10 = vector.load %arg2[%c1, %c0_11, %c0_12] : memref<8x128x4xf32, #tpu.memory_space<vmem>>, vector<1x128x4xf32>
    %11 = vector.shape_cast %10 : vector<1x128x4xf32> to vector<128x4xf32>
    %cst_13 = arith.constant dense<0.000000e+00> : vector<128x8xf32>
    %12 = tpu.matmul %11, %0, %cst_13 {dimension_numbers = #tpu.dot_dimension_numbers<[1], [0], [0], [1], [0, 0, 1, 1], [], []>} : vector<128x4xf32>, vector<4x8xf32>, vector<128x8xf32> -> vector<128x8xf32>
    %13 = arith.maximumf %9, %12 : vector<128x8xf32>
    %c2 = arith.constant 2 : index
    %c0_14 = arith.constant 0 : index
    %c0_15 = arith.constant 0 : index
    %14 = vector.load %arg2[%c2, %c0_14, %c0_15] : memref<8x128x4xf32, #tpu.memory_space<vmem>>, vector<1x128x4xf32>
    %15 = vector.shape_cast %14 : vector<1x128x4xf32> to vector<128x4xf32>
    %cst_16 = arith.constant dense<0.000000e+00> : vector<128x8xf32>
    %16 = tpu.matmul %15, %0, %cst_16 {dimension_numbers = #tpu.dot_dimension_numbers<[1], [0], [0], [1], [0, 0, 1, 1], [], []>} : vector<128x4xf32>, vector<4x8xf32>, vector<128x8xf32> -> vector<128x8xf32>
    %17 = arith.maximumf %13, %16 : vector<128x8xf32>
    %c3 = arith.constant 3 : index
    %c0_17 = arith.constant 0 : index
    %c0_18 = arith.constant 0 : index
    %18 = vector.load %arg2[%c3, %c0_17, %c0_18] : memref<8x128x4xf32, #tpu.memory_space<vmem>>, vector<1x128x4xf32>
    %19 = vector.shape_cast %18 : vector<1x128x4xf32> to vector<128x4xf32>
    %cst_19 = arith.constant dense<0.000000e+00> : vector<128x8xf32>
    %20 = tpu.matmul %19, %0, %cst_19 {dimension_numbers = #tpu.dot_dimension_numbers<[1], [0], [0], [1], [0, 0, 1, 1], [], []>} : vector<128x4xf32>, vector<4x8xf32>, vector<128x8xf32> -> vector<128x8xf32>
    %21 = arith.maximumf %17, %20 : vector<128x8xf32>
    %c4 = arith.constant 4 : index
    %c0_20 = arith.constant 0 : index
    %c0_21 = arith.constant 0 : index
    %22 = vector.load %arg2[%c4, %c0_20, %c0_21] : memref<8x128x4xf32, #tpu.memory_space<vmem>>, vector<1x128x4xf32>
    %23 = vector.shape_cast %22 : vector<1x128x4xf32> to vector<128x4xf32>
    %cst_22 = arith.constant dense<0.000000e+00> : vector<128x8xf32>
    %24 = tpu.matmul %23, %0, %cst_22 {dimension_numbers = #tpu.dot_dimension_numbers<[1], [0], [0], [1], [0, 0, 1, 1], [], []>} : vector<128x4xf32>, vector<4x8xf32>, vector<128x8xf32> -> vector<128x8xf32>
    %25 = arith.maximumf %21, %24 : vector<128x8xf32>
    %c5 = arith.constant 5 : index
    %c0_23 = arith.constant 0 : index
    %c0_24 = arith.constant 0 : index
    %26 = vector.load %arg2[%c5, %c0_23, %c0_24] : memref<8x128x4xf32, #tpu.memory_space<vmem>>, vector<1x128x4xf32>
    %27 = vector.shape_cast %26 : vector<1x128x4xf32> to vector<128x4xf32>
    %cst_25 = arith.constant dense<0.000000e+00> : vector<128x8xf32>
    %28 = tpu.matmul %27, %0, %cst_25 {dimension_numbers = #tpu.dot_dimension_numbers<[1], [0], [0], [1], [0, 0, 1, 1], [], []>} : vector<128x4xf32>, vector<4x8xf32>, vector<128x8xf32> -> vector<128x8xf32>
    %29 = arith.maximumf %25, %28 : vector<128x8xf32>
    %c6 = arith.constant 6 : index
    %c0_26 = arith.constant 0 : index
    %c0_27 = arith.constant 0 : index
    %30 = vector.load %arg2[%c6, %c0_26, %c0_27] : memref<8x128x4xf32, #tpu.memory_space<vmem>>, vector<1x128x4xf32>
    %31 = vector.shape_cast %30 : vector<1x128x4xf32> to vector<128x4xf32>
    %cst_28 = arith.constant dense<0.000000e+00> : vector<128x8xf32>
    %32 = tpu.matmul %31, %0, %cst_28 {dimension_numbers = #tpu.dot_dimension_numbers<[1], [0], [0], [1], [0, 0, 1, 1], [], []>} : vector<128x4xf32>, vector<4x8xf32>, vector<128x8xf32> -> vector<128x8xf32>
    %33 = arith.maximumf %29, %32 : vector<128x8xf32>
    %c7 = arith.constant 7 : index
    %c0_29 = arith.constant 0 : index
    %c0_30 = arith.constant 0 : index
    %34 = vector.load %arg2[%c7, %c0_29, %c0_30] : memref<8x128x4xf32, #tpu.memory_space<vmem>>, vector<1x128x4xf32>
    %35 = vector.shape_cast %34 : vector<1x128x4xf32> to vector<128x4xf32>
    %cst_31 = arith.constant dense<0.000000e+00> : vector<128x8xf32>
    %36 = tpu.matmul %35, %0, %cst_31 {dimension_numbers = #tpu.dot_dimension_numbers<[1], [0], [0], [1], [0, 0, 1, 1], [], []>} : vector<128x4xf32>, vector<4x8xf32>, vector<128x8xf32> -> vector<128x8xf32>
    %37 = arith.maximumf %33, %36 : vector<128x8xf32>
    %38 = arith.addf %6, %37 : vector<128x8xf32>
    %c0_32 = arith.constant 0 : index
    %c0_33 = arith.constant 0 : index
    %39 = vector.load %arg6[%c0_32, %c0_33] : memref<1x8xf32, #tpu.memory_space<vmem>>, vector<1x8xf32>
    %40 = vector.broadcast %39 : vector<1x8xf32> to vector<128x8xf32>
    %41 = arith.addf %38, %40 : vector<128x8xf32>
    %cst_34 = arith.constant 0.000000e+00 : f32
    %42 = vector.broadcast %cst_34 : f32 to vector<128x8xf32>
    %43 = arith.maximumf %41, %42 : vector<128x8xf32>
    %c0_35 = arith.constant 0 : index
    %c0_36 = arith.constant 0 : index
    %44 = vector.load %arg7[%c0_35, %c0_36] : memref<1x8xf32, #tpu.memory_space<vmem>>, vector<1x8xf32>
    %45 = vector.broadcast %44 : vector<1x8xf32> to vector<128x8xf32>
    %46 = arith.mulf %43, %45 : vector<128x8xf32>
    %cst_37 = arith.constant dense<0.000000e+00> : vector<128xf32>
    %47 = vector.multi_reduction <add>, %46, %cst_37 [1] : vector<128x8xf32> to vector<128xf32>
    %48 = vector.shape_cast %47 : vector<128xf32> to vector<128x1xf32>
    %c0_38 = arith.constant 0 : index
    %c0_39 = arith.constant 0 : index
    %49 = vector.load %arg8[%c0_38, %c0_39] : memref<1x1xf32, #tpu.memory_space<vmem>>, vector<1x1xf32>
    %50 = vector.broadcast %49 : vector<1x1xf32> to vector<128x1xf32>
    %51 = arith.addf %48, %50 : vector<128x1xf32>
    %cst_40 = arith.constant 5.000000e-01 : f32
    %52 = vector.broadcast %cst_40 : f32 to vector<128x1xf32>
    %53 = arith.mulf %52, %51 : vector<128x1xf32>
    %54 = math.tanh %53 : vector<128x1xf32>
    %cst_41 = arith.constant 5.000000e-01 : f32
    %55 = vector.broadcast %cst_41 : f32 to vector<128x1xf32>
    %56 = arith.mulf %55, %54 : vector<128x1xf32>
    %cst_42 = arith.constant 5.000000e-01 : f32
    %57 = vector.broadcast %cst_42 : f32 to vector<128x1xf32>
    %58 = arith.addf %57, %56 : vector<128x1xf32>
    %59 = tpu.transpose %58, [1, 0] : vector<128x1xf32> -> vector<1x128xf32>
    %c0_43 = arith.constant 0 : index
    %c0_44 = arith.constant 0 : index
    %c0_45 = arith.constant 0 : index
    %60 = vector.load %arg9[%c0_43, %c0_44, %c0_45] : memref<1x1x128xf32, #tpu.memory_space<vmem>>, vector<1x1x128xf32>
    %61 = vector.shape_cast %60 : vector<1x1x128xf32> to vector<1x128xf32>
    %62 = vector.shape_cast %59 : vector<1x128xf32> to vector<1x1x128xf32>
    tpu.vector_store %arg9[%c0_43, %c0_44, %c0_45], %62 {strides = array<i32>} : memref<1x1x128xf32, #tpu.memory_space<vmem>>, vector<1x1x128xf32>,
    return
  }
  func.func @transform_0(%arg0: i32) -> (i32, i32) {
    %c0_i32 = arith.constant 0 : i32
    %c0_i32_0 = arith.constant 0 : i32
    return %arg0, %c0_i32 : i32, i32
  }
  func.func @transform_1(%arg0: i32) -> (i32, i32, i32) {
    %c0_i32 = arith.constant 0 : i32
    %c0_i32_0 = arith.constant 0 : i32
    %c0_i32_1 = arith.constant 0 : i32
    return %c0_i32, %arg0, %c0_i32_0 : i32, i32, i32
  }
  func.func @transform_2(%arg0: i32) -> (i32, i32) {
    %c0_i32 = arith.constant 0 : i32
    %c0_i32_0 = arith.constant 0 : i32
    %c0_i32_1 = arith.constant 0 : i32
    return %c0_i32, %c0_i32_0 : i32, i32
  }
  func.func @transform_3(%arg0: i32) -> (i32, i32) {
    %c0_i32 = arith.constant 0 : i32
    %c0_i32_0 = arith.constant 0 : i32
    %c0_i32_1 = arith.constant 0 : i32
    return %c0_i32, %c0_i32_0 : i32, i32
  }
  func.func @transform_4(%arg0: i32) -> (i32, i32) {
    %c0_i32 = arith.constant 0 : i32
    %c0_i32_0 = arith.constant 0 : i32
    %c0_i32_1 = arith.constant 0 : i32
    return %c0_i32, %c0_i32_0 : i32, i32
  }
  func.func @transform_5(%arg0: i32) -> (i32, i32) {
    %c0_i32 = arith.constant 0 : i32
    %c0_i32_0 = arith.constant 0 : i32
    %c0_i32_1 = arith.constant 0 : i32
    return %c0_i32, %c0_i32_0 : i32, i32
  }
  func.func @transform_6(%arg0: i32) -> (i32, i32) {
    %c0_i32 = arith.constant 0 : i32
    %c0_i32_0 = arith.constant 0 : i32
    %c0_i32_1 = arith.constant 0 : i32
    return %c0_i32, %c0_i32_0 : i32, i32
  }
  func.func @transform_7(%arg0: i32) -> (i32, i32) {
    %c0_i32 = arith.constant 0 : i32
    %c0_i32_0 = arith.constant 0 : i32
    %c0_i32_1 = arith.constant 0 : i32
    return %c0_i32, %c0_i32_0 : i32, i32
  }
  func.func @transform_8(%arg0: i32) -> (i32, i32, i32) {
    %c0_i32 = arith.constant 0 : i32
    %c0_i32_0 = arith.constant 0 : i32
    %c0_i32_1 = arith.constant 0 : i32
    return %arg0, %c0_i32, %c0_i32_0 : i32, i32, i32
  }
}

module attributes {stable_mosaic.version = 11 : i64} {
  func.func @_alpha_upsample_kernel(%arg0: i32, %arg1: memref<1x4x4x4xf32, #tpu.memory_space<vmem>>, %arg2: memref<8x4xf32, #tpu.memory_space<vmem>>, %arg3: memref<4x8xf32, #tpu.memory_space<vmem>>, %arg4: memref<1x4x8x8xf32, #tpu.memory_space<vmem>>, %arg5: memref<1x4x8x8xf32, #tpu.memory_space<vmem>>) attributes {dimension_semantics = [#tpu.dimension_semantics<parallel>], iteration_bounds = array<i64: 2>, scalar_prefetch = 0 : i64, scratch_operands = 0 : i64, tpu.core_type = #tpu.core_type<tc>, window_params = [{transform_indices = @transform_0, window_bounds = array<i64: 1, 4, 4, 4>}, {pipeline_mode = #tpu.pipeline_mode<synchronous>, transform_indices = @transform_1, window_bounds = array<i64: 8, 4>}, {pipeline_mode = #tpu.pipeline_mode<synchronous>, transform_indices = @transform_2, window_bounds = array<i64: 4, 8>}, {transform_indices = @transform_3, window_bounds = array<i64: 1, 4, 8, 8>}, {transform_indices = @transform_4, window_bounds = array<i64: 1, 4, 8, 8>}]} {
    %c0 = arith.constant 0 : index
    %c0_0 = arith.constant 0 : index
    %c0_1 = arith.constant 0 : index
    %c0_2 = arith.constant 0 : index
    %0 = vector.load %arg1[%c0, %c0_0, %c0_1, %c0_2] : memref<1x4x4x4xf32, #tpu.memory_space<vmem>>, vector<1x4x4x4xf32>
    %1 = vector.shape_cast %0 : vector<1x4x4x4xf32> to vector<4x4x4xf32>
    %c0_3 = arith.constant 0 : index
    %c0_4 = arith.constant 0 : index
    %2 = vector.load %arg3[%c0_3, %c0_4] : memref<4x8xf32, #tpu.memory_space<vmem>>, vector<4x8xf32>
    %3 = vector.shape_cast %2 : vector<4x8xf32> to vector<1x4x8xf32>
    %4 = vector.broadcast %3 : vector<1x4x8xf32> to vector<4x4x8xf32>
    %cst = arith.constant dense<0.000000e+00> : vector<4x4x8xf32>
    %5 = tpu.matmul %1, %4, %cst {dimension_numbers = #tpu.dot_dimension_numbers<[2], [1], [1], [2], [0, 0, 0, 1, 1, 2], [0], [0]>} : vector<4x4x4xf32>, vector<4x4x8xf32>, vector<4x4x8xf32> -> vector<4x4x8xf32>
    %c0_5 = arith.constant 0 : index
    %c0_6 = arith.constant 0 : index
    %6 = vector.load %arg2[%c0_5, %c0_6] : memref<8x4xf32, #tpu.memory_space<vmem>>, vector<8x4xf32>
    %7 = vector.shape_cast %6 : vector<8x4xf32> to vector<1x8x4xf32>
    %8 = vector.broadcast %7 : vector<1x8x4xf32> to vector<4x8x4xf32>
    %cst_7 = arith.constant dense<0.000000e+00> : vector<4x8x8xf32>
    %9 = tpu.matmul %8, %5, %cst_7 {dimension_numbers = #tpu.dot_dimension_numbers<[2], [1], [1], [2], [0, 0, 0, 1, 1, 2], [0], [0]>} : vector<4x8x4xf32>, vector<4x4x8xf32>, vector<4x8x8xf32> -> vector<4x8x8xf32>
    %10 = vector.extract_strided_slice %9 {offsets = [0, 0, 0], sizes = [1, 8, 8], strides = [1, 1, 1]} : vector<4x8x8xf32> to vector<1x8x8xf32>
    %11 = vector.extract_strided_slice %9 {offsets = [0, 0, 0], sizes = [3, 8, 8], strides = [1, 1, 1]} : vector<4x8x8xf32> to vector<3x8x8xf32>
    %12 = tpu.concatenate %10, %11 in 0 : vector<1x8x8xf32>, vector<3x8x8xf32> -> vector<4x8x8xf32>
    %13 = vector.extract_strided_slice %9 {offsets = [1, 0, 0], sizes = [3, 8, 8], strides = [1, 1, 1]} : vector<4x8x8xf32> to vector<3x8x8xf32>
    %14 = vector.extract_strided_slice %9 {offsets = [3, 0, 0], sizes = [1, 8, 8], strides = [1, 1, 1]} : vector<4x8x8xf32> to vector<1x8x8xf32>
    %15 = tpu.concatenate %13, %14 in 0 : vector<3x8x8xf32>, vector<1x8x8xf32> -> vector<4x8x8xf32>
    %cst_8 = arith.constant 7.500000e-01 : f32
    %16 = vector.broadcast %cst_8 : f32 to vector<4x8x8xf32>
    %17 = arith.mulf %16, %9 : vector<4x8x8xf32>
    %cst_9 = arith.constant 2.500000e-01 : f32
    %18 = vector.broadcast %cst_9 : f32 to vector<4x8x8xf32>
    %19 = arith.mulf %18, %12 : vector<4x8x8xf32>
    %20 = arith.addf %17, %19 : vector<4x8x8xf32>
    %c0_10 = arith.constant 0 : index
    %c0_11 = arith.constant 0 : index
    %c0_12 = arith.constant 0 : index
    %c0_13 = arith.constant 0 : index
    %21 = vector.load %arg4[%c0_10, %c0_11, %c0_12, %c0_13] : memref<1x4x8x8xf32, #tpu.memory_space<vmem>>, vector<1x4x8x8xf32>
    %22 = vector.shape_cast %21 : vector<1x4x8x8xf32> to vector<4x8x8xf32>
    %23 = vector.shape_cast %20 : vector<4x8x8xf32> to vector<1x4x8x8xf32>
    tpu.vector_store %arg4[%c0_10, %c0_11, %c0_12, %c0_13], %23 {strides = array<i32>} : memref<1x4x8x8xf32, #tpu.memory_space<vmem>>, vector<1x4x8x8xf32>,
    %cst_14 = arith.constant 7.500000e-01 : f32
    %24 = vector.broadcast %cst_14 : f32 to vector<4x8x8xf32>
    %25 = arith.mulf %24, %9 : vector<4x8x8xf32>
    %cst_15 = arith.constant 2.500000e-01 : f32
    %26 = vector.broadcast %cst_15 : f32 to vector<4x8x8xf32>
    %27 = arith.mulf %26, %15 : vector<4x8x8xf32>
    %28 = arith.addf %25, %27 : vector<4x8x8xf32>
    %c0_16 = arith.constant 0 : index
    %c0_17 = arith.constant 0 : index
    %c0_18 = arith.constant 0 : index
    %c0_19 = arith.constant 0 : index
    %29 = vector.load %arg5[%c0_16, %c0_17, %c0_18, %c0_19] : memref<1x4x8x8xf32, #tpu.memory_space<vmem>>, vector<1x4x8x8xf32>
    %30 = vector.shape_cast %29 : vector<1x4x8x8xf32> to vector<4x8x8xf32>
    %31 = vector.shape_cast %28 : vector<4x8x8xf32> to vector<1x4x8x8xf32>
    tpu.vector_store %arg5[%c0_16, %c0_17, %c0_18, %c0_19], %31 {strides = array<i32>} : memref<1x4x8x8xf32, #tpu.memory_space<vmem>>, vector<1x4x8x8xf32>,
    return
  }
  func.func @transform_0(%arg0: i32) -> (i32, i32, i32, i32) {
    %c0_i32 = arith.constant 0 : i32
    %c0_i32_0 = arith.constant 0 : i32
    %c0_i32_1 = arith.constant 0 : i32
    %c0_i32_2 = arith.constant 0 : i32
    return %arg0, %c0_i32, %c0_i32_0, %c0_i32_1 : i32, i32, i32, i32
  }
  func.func @transform_1(%arg0: i32) -> (i32, i32) {
    %c0_i32 = arith.constant 0 : i32
    %c0_i32_0 = arith.constant 0 : i32
    %c0_i32_1 = arith.constant 0 : i32
    return %c0_i32, %c0_i32_0 : i32, i32
  }
  func.func @transform_2(%arg0: i32) -> (i32, i32) {
    %c0_i32 = arith.constant 0 : i32
    %c0_i32_0 = arith.constant 0 : i32
    %c0_i32_1 = arith.constant 0 : i32
    return %c0_i32, %c0_i32_0 : i32, i32
  }
  func.func @transform_3(%arg0: i32) -> (i32, i32, i32, i32) {
    %c0_i32 = arith.constant 0 : i32
    %c0_i32_0 = arith.constant 0 : i32
    %c0_i32_1 = arith.constant 0 : i32
    %c0_i32_2 = arith.constant 0 : i32
    return %arg0, %c0_i32, %c0_i32_0, %c0_i32_1 : i32, i32, i32, i32
  }
  func.func @transform_4(%arg0: i32) -> (i32, i32, i32, i32) {
    %c0_i32 = arith.constant 0 : i32
    %c0_i32_0 = arith.constant 0 : i32
    %c0_i32_1 = arith.constant 0 : i32
    %c0_i32_2 = arith.constant 0 : i32
    return %arg0, %c0_i32, %c0_i32_0, %c0_i32_1 : i32, i32, i32, i32
  }
}

module attributes {stable_mosaic.version = 11 : i64} {
  func.func @_gate_kernel(%arg0: i32, %arg1: i32, %arg2: i32, %arg3: memref<1x4x8x64xf32, #tpu.memory_space<vmem>>, %arg4: memref<1x8x64xf32, #tpu.memory_space<vmem>>, %arg5: memref<1x4x8x64xf32, #tpu.memory_space<vmem>>) attributes {dimension_semantics = [#tpu.dimension_semantics<parallel>, #tpu.dimension_semantics<parallel>, #tpu.dimension_semantics<arbitrary>], iteration_bounds = array<i64: 2, 1, 1>, scalar_prefetch = 0 : i64, scratch_operands = 0 : i64, tpu.core_type = #tpu.core_type<tc>, window_params = [{transform_indices = @transform_0, window_bounds = array<i64: 1, 4, 8, 64>}, {transform_indices = @transform_1, window_bounds = array<i64: 1, 8, 64>}, {transform_indices = @transform_2, window_bounds = array<i64: 1, 4, 8, 64>}]} {
    %c0 = arith.constant 0 : index
    %c0_0 = arith.constant 0 : index
    %c0_1 = arith.constant 0 : index
    %c0_2 = arith.constant 0 : index
    %0 = vector.load %arg3[%c0, %c0_0, %c0_1, %c0_2] : memref<1x4x8x64xf32, #tpu.memory_space<vmem>>, vector<1x4x8x64xf32>
    %c0_3 = arith.constant 0 : index
    %c0_4 = arith.constant 0 : index
    %c0_5 = arith.constant 0 : index
    %1 = vector.load %arg4[%c0_3, %c0_4, %c0_5] : memref<1x8x64xf32, #tpu.memory_space<vmem>>, vector<1x8x64xf32>
    %2 = vector.shape_cast %1 : vector<1x8x64xf32> to vector<1x1x8x64xf32>
    %3 = vector.broadcast %2 : vector<1x1x8x64xf32> to vector<1x4x8x64xf32>
    %4 = arith.mulf %0, %3 : vector<1x4x8x64xf32>
    %c0_6 = arith.constant 0 : index
    %c0_7 = arith.constant 0 : index
    %c0_8 = arith.constant 0 : index
    %c0_9 = arith.constant 0 : index
    %5 = vector.load %arg5[%c0_6, %c0_7, %c0_8, %c0_9] : memref<1x4x8x64xf32, #tpu.memory_space<vmem>>, vector<1x4x8x64xf32>
    tpu.vector_store %arg5[%c0_6, %c0_7, %c0_8, %c0_9], %4 {strides = array<i32>} : memref<1x4x8x64xf32, #tpu.memory_space<vmem>>, vector<1x4x8x64xf32>,
    return
  }
  func.func @transform_0(%arg0: i32, %arg1: i32, %arg2: i32) -> (i32, i32, i32, i32) {
    %c0_i32 = arith.constant 0 : i32
    %c0_i32_0 = arith.constant 0 : i32
    return %arg0, %arg2, %arg1, %c0_i32 : i32, i32, i32, i32
  }
  func.func @transform_1(%arg0: i32, %arg1: i32, %arg2: i32) -> (i32, i32, i32) {
    %c0_i32 = arith.constant 0 : i32
    %c0_i32_0 = arith.constant 0 : i32
    return %arg0, %arg1, %c0_i32 : i32, i32, i32
  }
  func.func @transform_2(%arg0: i32, %arg1: i32, %arg2: i32) -> (i32, i32, i32, i32) {
    %c0_i32 = arith.constant 0 : i32
    %c0_i32_0 = arith.constant 0 : i32
    return %arg0, %arg2, %arg1, %c0_i32 : i32, i32, i32, i32
  }
}

</mosaic_0001>

<bundles_post_ra>
// kernel: _lambda_.4
= control target key start
LH: loop header
LB: loop body
LE: loop exit
PB: predicated region body
PF: predicated region fallthrough
CT: control target
= control target key end

     0   :  { %s1055_s15 = smov 0   ;;  %s1117_s0 = inlined_call_operand.vmem [shape: f32[2,4,4,4], index: 0, kind: input, shape index: {}]   ;;  %s1118_s1 = inlined_call_operand.vmem [shape: f32[8,4], index: 1, kind: input, shape index: {}]   ;;  %s1119_s2 = inlined_call_operand.vmem [shape: f32[4,8], index: 2, kind: input, shape index: {}]   ;;  %s1120_s3 = inlined_call_operand.vmem [shape: f32[2,4,8,8], index: 3, kind: output, shape index: {0}]   ;;  %s1121_s4 = inlined_call_operand.vmem [shape: f32[2,4,8,8], index: 4, kind: output, shape index: {1}]  }
   0x1 LB: > { %s922_s16 = sadd.s32 4294967295, %s1026_s15   ;;  %p926_p0 = scmp.ge.s32.totalorder %s1026_s15, 1  ;;  %s1026_s15 = sphi %s1055_s15, %s15_s15  }
   0x2   : > { %p165_p1 = scmp.lt.s32.totalorder %s1026_s15, 3 }
   0x4   : > { %p166_p2 = pnand %p926_p0, %p165_p1 }
   0x5   : > { %v215_v0 = vld [vmem:[%s1119_s2] sm:$0xf] (!%p166_p2)  ;;  %vm220_vm0 = vcmask (!%p166_p2), 1043456   ;;  %p196_p3 = scmp.lt.s32.totalorder (!%p166_p2), %s922_s16, 1  ;;  %v1028_v1 = vmov (!%p166_p2), 0.0   ;;  %vm1029_vm1 = vmmov (!%p166_p2), 0  }
   0x6   : > { %169 = sbr.rel (%p166_p2) target bundleno = 453 (0x1c5), region = 32  ;;  %970 = vmatprep.subr.mxu0 (!%p166_p2), %v1028_v1  ;;  %975 = vmatprep.subr.mxu1 (!%p166_p2), %v1028_v1  ;;  %vm216_vm2 = vcmask (!%p166_p2), 31744   ;;  %v513_v6 = vld [vmem:[%s1118_s1] sm:$0xff] (!%p166_p2)  ;;  %vm820_vm3 = vcmask (!%p166_p2), 64512  }
   0x7   : > { %971 = vmatpush3.msk.msra.mxu0 (!%p166_p2), %vm220_vm0, %v215_v0  ;;  %972 = vmatprep.mubr.msk.f32.mxu0 (!%p166_p2), %vm1029_vm1, %v1028_v1 }
   0x8   : > { %976 = vmatpush3.msk.msra.mxu1 (!%p166_p2), %vm220_vm0, %v215_v0  ;;  %977 = vmatprep.mubr.msk.f32.mxu1 (!%p166_p2), %vm1029_vm1, %v1028_v1 }
   0x9   : > { %980 = vmatprep.subr.mxu0 (!%p166_p2), %v1028_v1  ;;  %985 = vmatprep.subr.mxu1 (!%p166_p2), %v1028_v1 }
   0xd   : > { %s1123_s16 = smov (!%p196_p3, %s922_s16), 1 }
   0xe   : > { %s951_s19 = sshll.u32 %s1123_s16, 4  ;;  %s952_s25 = sshll.u32 %s1123_s16, 5 }
   0xf   : > { %s200_s22 = scalar_lea.vmem %s1117_s0, %s951_s19  ;;  %s205_s28 = scalar_lea.vmem %s1120_s3, %s952_s25 }
  0x10   : > { %v211_v2 = vld [vmem:[%s200_s22] sm:$0xf]  ;;  %v212_v3 = vld [vmem:[%s200_s22 + $0x4] sm:$0xf]  ;;  %v213_v4 = vld [vmem:[%s200_s22 + $0x8] sm:$0xf]  ;;  %s210_s5 = scalar_lea.vmem %s1121_s4, %s952_s25 }
  0x11   : > { %973 = vmatmul.mubr.msk.f32.vlgmr.msra.gmra.mrb[0].mxu0 %vm216_vm2, %v211_v2  ;;  %978 = vmatmul.mubr.msk.f32.vlgmr.msra.gmra.mrb[0].mxu1 %vm216_vm2, %v212_v3  ;;  %v214_v5 = vld [vmem:[%s200_s22 + $0xc] sm:$0xf] }
  0x12   : > { %981 = vmatpush3.msk.msra.mxu0 %vm220_vm0, %v215_v0  ;;  %982 = vmatprep.mubr.msk.f32.mxu0 %vm1029_vm1, %v1028_v1 }
  0x13   : > { %986 = vmatpush3.msk.msra.mxu1 %vm220_vm0, %v215_v0  ;;  %987 = vmatprep.mubr.msk.f32.mxu1 %vm1029_vm1, %v1028_v1 }
  0x14   : > { %990 = vmatprep.subr.mxu0 %v1028_v1  ;;  %995 = vmatprep.subr.mxu1 %v1028_v1 }
  0x15   : > { %983 = vmatmul.mubr.msk.f32.vlgmr.msra.gmra.mrb[2].mxu0 %vm216_vm2, %v213_v4  ;;  %988 = vmatmul.mubr.msk.f32.vlgmr.msra.gmra.mrb[2].mxu1 %vm216_vm2, %v214_v5 }
  0x16   : > { %992 = vmatprep.mubr.msk.f32.mxu0 %vm1029_vm1, %v1028_v1  ;;  %997 = vmatprep.mubr.msk.f32.mxu1 %vm1029_vm1, %v1028_v1 }
  0xe4   : > { %v290_v7 = vpop.f32.mrb[0].mxu0  ;;  %v363_v8 = vpop.f32.mrb[0].mxu1 }
  0xe5   : > { %v974_v9 = vpop.f32.mrb[1].mxu0  ;;  %v979_v10 = vpop.f32.mrb[1].mxu1  ;;  %991 = vmatpush3.msk.msra.mxu0 %vm220_vm0, %v290_v7  ;;  %996 = vmatpush3.msk.msra.mxu1 %vm220_vm0, %v363_v8 }
  0xe6   : > { %993 = vmatmul.mubr.msk.f32.vlgmr.msra.gmra.mrb[4].mxu0 %vm216_vm2, %v513_v6  ;;  %998 = vmatmul.mubr.msk.f32.vlgmr.msra.gmra.mrb[4].mxu1 %vm216_vm2, %v513_v6 }
  0xe7   : > { %1000 = vmatprep.subr.mxu0 %v1028_v1  ;;  %1005 = vmatprep.subr.mxu1 %v1028_v1 }
  0xe8   : > { %v436_v11 = vpop.f32.mrb[2].mxu0  ;;  %v509_v12 = vpop.f32.mrb[2].mxu1  ;;  %1002 = vmatprep.mubr.msk.f32.mxu0 %vm1029_vm1, %v1028_v1  ;;  %1007 = vmatprep.mubr.msk.f32.mxu1 %vm1029_vm1, %v1028_v1 }
  0xe9   : > { %v984_v13 = vpop.f32.mrb[3].mxu0  ;;  %v989_v14 = vpop.f32.mrb[3].mxu1  ;;  %1001 = vmatpush3.msk.msra.mxu0 %vm220_vm0, %v436_v11  ;;  %1006 = vmatpush3.msk.msra.mxu1 %vm220_vm0, %v509_v12 }
  0xea   : > { %1003 = vmatmul.mubr.msk.f32.vlgmr.msra.gmra.mrb[6].mxu0 %vm216_vm2, %v513_v6  ;;  %1008 = vmatmul.mubr.msk.f32.vlgmr.msra.gmra.mrb[6].mxu1 %vm216_vm2, %v513_v6 }
 0x1b9   : > { %v586_v15 = vpop.f32.mrb[4].mxu0  ;;  %v659_v16 = vpop.f32.mrb[4].mxu1 }
 0x1ba   : > { %v809_v17 = vmul.f32 0.75, %v586_v15  ;;  %v813_v18 = vmul.f32 0.25, %v586_v15  ;;  %v810_v19 = vmul.f32 0.75, %v659_v16  ;;  %v814_v20 = vmul.f32 0.25, %v659_v16  ;;  %v994_v21 = vpop.f32.mrb[5].mxu0  ;;  %v999_v22 = vpop.f32.mrb[5].mxu1 }
 0x1bc   : > { %v816_v23 = vadd.f32 %v813_v18, %v809_v17  ;;  %v817_v24 = vadd.f32 %v813_v18, %v810_v19  ;;  %v826_v25 = vadd.f32 %v814_v20, %v809_v17 }
 0x1bd   : > { %v732_v26 = vpop.f32.mrb[6].mxu0  ;;  %v805_v27 = vpop.f32.mrb[6].mxu1 }
 0x1be   : > { %821 = vst.msk [vmem:[%s205_s28] sm:$0xff] %vm820_vm3, %v816_v23  ;;  %822 = vst.msk [vmem:[%s205_s28 + $0x8] sm:$0xff] %vm820_vm3, %v817_v24  ;;  %v811_v28 = vmul.f32 0.75, %v732_v26  ;;  %v815_v29 = vmul.f32 0.25, %v732_v26  ;;  %v812_v30 = vmul.f32 0.75, %v805_v27  ;;  %v825_v31 = vmul.f32 0.25, %v805_v27 }
 0x1bf   : > { %830 = vst.msk [vmem:[%s210_s5] sm:$0xff] %vm820_vm3, %v826_v25  ;;  %v1004_v32 = vpop.f32.mrb[7].mxu0  ;;  %v1009_v33 = vpop.f32.mrb[7].mxu1 }
 0x1c0   : > { %v818_v34 = vadd.f32 %v814_v20, %v811_v28  ;;  %v827_v35 = vadd.f32 %v815_v29, %v810_v19  ;;  %v819_v36 = vadd.f32 %v815_v29, %v812_v30  ;;  %v828_v37 = vadd.f32 %v825_v31, %v811_v28 }
 0x1c1   : > { %v829_v38 = vadd.f32 %v825_v31, %v812_v30 }
 0x1c2   : > { %823 = vst.msk [vmem:[%s205_s28 + $0x10] sm:$0xff] %vm820_vm3, %v818_v34  ;;  %831 = vst.msk [vmem:[%s210_s5 + $0x8] sm:$0xff] %vm820_vm3, %v827_v35 }
 0x1c3   : > { %824 = vst.msk [vmem:[%s205_s28 + $0x18] sm:$0xff] %vm820_vm3, %v819_v36  ;;  %832 = vst.msk [vmem:[%s210_s5 + $0x10] sm:$0xff] %vm820_vm3, %v828_v37 }
 0x1c4   : > { %833 = vst.msk [vmem:[%s210_s5 + $0x18] sm:$0xff] %vm820_vm3, %v829_v38 }
 0x1c5 PF: > { %s15_s15 = sadd.s32 1, %s1026_s15  }
 0x1c6   : > { %p12_p4 = scmp.ge.s32.totalorder %s15_s15, 4  }
 0x1c8   :  { %14 = sbr.rel (!%p12_p4) target bundleno = 1 (0x1), region = 74 }

// kernel: _lambda_.5
= control target key start
LH: loop header
LB: loop body
LE: loop exit
PB: predicated region body
PF: predicated region fallthrough
CT: control target
= control target key end

     0   :  { %s446_s9 = smov 0   ;;  %s448_s10 = smov 0   ;;  %s479_s0 = inlined_call_operand.vmem [shape: f32[2,4,8,64], index: 0, kind: input, shape index: {}]   ;;  %s480_s1 = inlined_call_operand.vmem [shape: f32[2,8,64], index: 1, kind: input, shape index: {}]   ;;  %s481_s2 = inlined_call_operand.vmem [shape: f32[2,4,8,64], index: 2, kind: output, shape index: {}]  }
   0x1   :  { %s450_s11 = smov 0  }
   0x2 LB: > { %s31_s12 = sadd.s32 1, %s425_s10  ;;  %p373_p0 = scmp.ge.s32.totalorder %s429_s11, 1  ;;  %s429_s11 = sphi %s450_s11, %s12_s11   ;;  %s425_s10 = sphi %s448_s10, %s483_s10   ;;  %s421_s9 = sphi %s446_s9, %s482_s9  }
   0x3   : > { %p33_p1 = scmp.ge.s32.totalorder %s31_s12, 2  ;;  %p161_p2 = scmp.lt.s32.totalorder %s429_s11, 3 }
   0x5   : > { %s485_s12 = smov (%p33_p1, %s31_s12), 0  ;;  %p162_p3 = pnand %p373_p0, %p161_p2 }
   0x6   : > { %p205_p4 = scmp.lt.s32.totalorder (!%p162_p3), %s421_s9, 1  ;;  %vm246_vm0 = vcmask (!%p162_p3), 523264  }
   0x7   : > { %165 = sbr.rel (%p162_p3) target bundleno = 23 (0x17), region = 28 }
   0xe   : > { %s487_s9 = smov (!%p205_p4, %s421_s9), 1 }
   0xf   : > { %s381_s13 = sshll.u32 %s487_s9, 5  ;;  %s376_s14 = sshll.u32 %s487_s9, 3 }
  0x10   : > { %s215_s17 = scalar_lea.vmem %s479_s0, %s381_s13  ;;  %s223_s20 = scalar_lea.vmem %s480_s1, %s376_s14 }
  0x11   : > { %s235_s23 = scalar_lea.vmem %s481_s2, %s381_s13  ;;  %v237_v0 = vld [vmem:[%s215_s17] sm:$0xff]  ;;  %v238_v2 = vld [vmem:[%s215_s17 + $0x8] sm:$0xff]  ;;  %v239_v5 = vld [vmem:[%s215_s17 + $0x10] sm:$0xff] }
  0x12   : > { %v241_v1 = vld [vmem:[%s223_s20] sm:$0xff]  ;;  %v240_v6 = vld [vmem:[%s215_s17 + $0x18] sm:$0xff] }
  0x13   : > { %v242_v3 = vmul.f32 %v241_v1, %v237_v0  ;;  %v243_v4 = vmul.f32 %v241_v1, %v238_v2  ;;  %v244_v7 = vmul.f32 %v241_v1, %v239_v5  ;;  %v245_v8 = vmul.f32 %v241_v1, %v240_v6 }
  0x15   : > { %247 = vst.msk [vmem:[%s235_s23] sm:$0xff] %vm246_vm0, %v242_v3  ;;  %248 = vst.msk [vmem:[%s235_s23 + $0x8] sm:$0xff] %vm246_vm0, %v243_v4 }
  0x16   : > { %249 = vst.msk [vmem:[%s235_s23 + $0x10] sm:$0xff] %vm246_vm0, %v244_v7  ;;  %250 = vst.msk [vmem:[%s235_s23 + $0x18] sm:$0xff] %vm246_vm0, %v245_v8 }
  0x17 PF: > { %s12_s11 = sadd.s32 1, %s429_s11   ;;  %s482_s9 = smov %s425_s10 }
  0x18   : > { %p9_p5 = scmp.ge.s32.totalorder %s12_s11, 4   ;;  %s483_s10 = smov %s485_s12 }
  0x1a   :  { %11 = sbr.rel (!%p9_p5) target bundleno = 2 (0x2), region = 61 }

// kernel: _lambda_.3
= control target key start
LH: loop header
LB: loop body
LE: loop exit
PB: predicated region body
PF: predicated region fallthrough
CT: control target
= control target key end

     0   :  { %vm56_vm0 = vcmask 64512   ;;  %vm315_vm1 = vcmask 1043456   ;;  %vm266_vm2 = vcmask 31744   ;;  %s4052_s2 = inlined_call_operand.vmem [shape: f32[8,8], index: 2, kind: input, shape index: {}]   ;;  %s4053_s0 = inlined_call_operand.vmem [shape: f32[128,8], index: 0, kind: input, shape index: {}]   ;;  %s4054_s4 = inlined_call_operand.vmem [shape: f32[4,8], index: 4, kind: input, shape index: {}]   ;;  %s4055_s1 = inlined_call_operand.vmem [shape: f32[8,128,4], index: 1, kind: input, shape index: {}]   ;;  %s4056_s7 = inlined_call_operand.<no memory space> [shape: f32[1,1], index: 7, kind: input, shape index: {}]   ;;  %s4057_s3 = inlined_call_operand.vmem [shape: f32[1,8], index: 3, kind: input, shape index: {}]   ;;  %s4058_s5 = inlined_call_operand.vmem [shape: f32[1,8], index: 5, kind: input, shape index: {}]   ;;  %s4059_s6 = inlined_call_operand.vmem [shape: f32[1,8], index: 6, kind: input, shape index: {}]   ;;  %s4060_s8 = inlined_call_operand.vmem [shape: f32[1,1,128], index: 8, kind: output, shape index: {}]  }
   0x1   :  { %v48_v0 = vld [vmem:[%s4052_s2] sm:$0xff]  ;;  %v33_v3 = vld [vmem:[%s4053_s0 + $0x8] sm:$0xff]  ;;  %v34_v6 = vld [vmem:[%s4053_s0 + $0x10] sm:$0xff] }
   0x2   :  { %v32_v1 = vld [vmem:[%s4053_s0] sm:$0xff]  ;;  %2717 = vmatprep.subr.mxu0 %v48_v0  ;;  %2951 = vmatprep.subr.mxu1 %v48_v0  ;;  %v41_v4 = vld [vmem:[%s4053_s0 + $0x48] sm:$0xff]  ;;  %v42_v7 = vld [vmem:[%s4053_s0 + $0x50] sm:$0xff] }
   0x3   :  { %v40_v2 = vld [vmem:[%s4053_s0 + $0x40] sm:$0xff]  ;;  %2718 = vmatpush3.msra.mxu0 %v48_v0  ;;  %2952 = vmatpush3.msra.mxu1 %v48_v0  ;;  %v35_v8 = vld [vmem:[%s4053_s0 + $0x18] sm:$0xff]  ;;  %v37_v12 = vld [vmem:[%s4053_s0 + $0x28] sm:$0xff] }
   0x4   :  { %v3048_v5 = vld [vmem:[%s4054_s4] sm:$0xf]  ;;  %2719 = vmatprep.mubr.msk.f32.mxu0 %vm56_vm0, %v32_v1  ;;  %2731 = vmatprep.mubr.msk.f32.mxu1 %vm56_vm0, %v40_v2  ;;  %v43_v9 = vld [vmem:[%s4053_s0 + $0x58] sm:$0xff]  ;;  %v45_v13 = vld [vmem:[%s4053_s0 + $0x68] sm:$0xff] }
   0x5   :  { %2720 = vmatmul.mubr.msk.f32.vlgmr.msra.gmra.mrb[0].mxu0 %vm56_vm0, %v33_v3  ;;  %2732 = vmatmul.mubr.msk.f32.vlgmr.msra.gmra.mrb[0].mxu1 %vm56_vm0, %v41_v4  ;;  %v36_v10 = vld [vmem:[%s4053_s0 + $0x20] sm:$0xff]  ;;  %v38_v14 = vld [vmem:[%s4053_s0 + $0x30] sm:$0xff]  ;;  %v39_v16 = vld [vmem:[%s4053_s0 + $0x38] sm:$0xff] }
   0x6   :  { %2743 = vmatprep.subr.msk.mxu1 %vm315_vm1, %v3048_v5  ;;  %2769 = vmatprep.subr.msk.mxu0 %vm315_vm1, %v3048_v5  ;;  %v44_v11 = vld [vmem:[%s4053_s0 + $0x60] sm:$0xff]  ;;  %v46_v15 = vld [vmem:[%s4053_s0 + $0x70] sm:$0xff]  ;;  %v47_v17 = vld [vmem:[%s4053_s0 + $0x78] sm:$0xff] }
   0x7   :  { %2744 = vmatpush3.msk.msra.mxu1 %vm315_vm1, %v3048_v5  ;;  %2722 = vmatprep.mubr.msk.f32.mxu0 %vm56_vm0, %v34_v6  ;;  %v250_v18 = vld [vmem:[%s4055_s1] sm:$0xff]  ;;  %v251_v20 = vld [vmem:[%s4055_s1 + $0x8] sm:$0xff]  ;;  %v252_v22 = vld [vmem:[%s4055_s1 + $0x10] sm:$0xff] }
   0x8   :  { %2734 = vmatprep.mubr.msk.f32.mxu1 %vm56_vm0, %v42_v7  ;;  %2770 = vmatpush3.msk.msra.mxu0 %vm315_vm1, %v3048_v5  ;;  %v2330_v19 = vld [vmem:[%s4055_s1 + $0x80] sm:$0xff]  ;;  %v2331_v21 = vld [vmem:[%s4055_s1 + $0x88] sm:$0xff]  ;;  %v2332_v23 = vld [vmem:[%s4055_s1 + $0x90] sm:$0xff] }
   0x9   :  { %2723 = vmatmul.mubr.msk.f32.gmra.mrb[2].mxu0 %vm56_vm0, %v35_v8  ;;  %2735 = vmatmul.mubr.msk.f32.gmra.mrb[2].mxu1 %vm56_vm0, %v43_v9  ;;  %v253_v24 = vld [vmem:[%s4055_s1 + $0x18] sm:$0xff]  ;;  %v254_v26 = vld [vmem:[%s4055_s1 + $0x20] sm:$0xff]  ;;  %v255_v28 = vld [vmem:[%s4055_s1 + $0x28] sm:$0xff] }
   0xa   :  { %2725 = vmatprep.mubr.msk.f32.mxu0 %vm56_vm0, %v36_v10  ;;  %2737 = vmatprep.mubr.msk.f32.mxu1 %vm56_vm0, %v44_v11  ;;  %v2333_v25 = vld [vmem:[%s4055_s1 + $0x98] sm:$0xff]  ;;  %v2334_v27 = vld [vmem:[%s4055_s1 + $0xa0] sm:$0xff]  ;;  %v2335_v29 = vld [vmem:[%s4055_s1 + $0xa8] sm:$0xff] }
   0xb   :  { %2795 = vmatprep.subr.msk.mxu1 %vm315_vm1, %v3048_v5  ;;  %2821 = vmatprep.subr.msk.mxu0 %vm315_vm1, %v3048_v5  ;;  %v256_v30 = vld [vmem:[%s4055_s1 + $0x30] sm:$0xff]  ;;  %v257_v32 = vld [vmem:[%s4055_s1 + $0x38] sm:$0xff]  ;;  %v258_v34 = vld [vmem:[%s4055_s1 + $0x40] sm:$0xff] }
   0xc   :  { %v2336_v31 = vld [vmem:[%s4055_s1 + $0xb0] sm:$0xff]  ;;  %v2337_v33 = vld [vmem:[%s4055_s1 + $0xb8] sm:$0xff]  ;;  %v2338_v35 = vld [vmem:[%s4055_s1 + $0xc0] sm:$0xff] }
   0xd   :  { %2726 = vmatmul.mubr.msk.f32.gmra.mrb[4].mxu0 %vm56_vm0, %v37_v12  ;;  %2738 = vmatmul.mubr.msk.f32.gmra.mrb[4].mxu1 %vm56_vm0, %v45_v13  ;;  %v259_v36 = vld [vmem:[%s4055_s1 + $0x48] sm:$0xff]  ;;  %v260_v38 = vld [vmem:[%s4055_s1 + $0x50] sm:$0xff]  ;;  %v261_v40 = vld [vmem:[%s4055_s1 + $0x58] sm:$0xff] }
   0xe   :  { %2728 = vmatprep.mubr.msk.f32.mxu0 %vm56_vm0, %v38_v14  ;;  %2740 = vmatprep.mubr.msk.f32.mxu1 %vm56_vm0, %v46_v15  ;;  %v2339_v37 = vld [vmem:[%s4055_s1 + $0xc8] sm:$0xff]  ;;  %v2340_v39 = vld [vmem:[%s4055_s1 + $0xd0] sm:$0xff]  ;;  %v2341_v41 = vld [vmem:[%s4055_s1 + $0xd8] sm:$0xff] }
   0xf   :  { %v262_v42 = vld [vmem:[%s4055_s1 + $0x60] sm:$0xff]  ;;  %v263_v44 = vld [vmem:[%s4055_s1 + $0x68] sm:$0xff]  ;;  %v264_v46 = vld [vmem:[%s4055_s1 + $0x70] sm:$0xff] }
  0x10   :  { %v2342_v43 = vld [vmem:[%s4055_s1 + $0xe0] sm:$0xff]  ;;  %v2343_v45 = vld [vmem:[%s4055_s1 + $0xe8] sm:$0xff]  ;;  %v2344_v47 = vld [vmem:[%s4055_s1 + $0xf0] sm:$0xff] }
  0x11   :  { %2729 = vmatmul.mubr.msk.f32.gmra.mrb[6].mxu0 %vm56_vm0, %v39_v16  ;;  %2741 = vmatmul.mubr.msk.f32.gmra.mrb[6].mxu1 %vm56_vm0, %v47_v17  ;;  %v265_v48 = vld [vmem:[%s4055_s1 + $0x78] sm:$0xff]  ;;  %v2363_v50 = vld [vmem:[%s4055_s1 + $0x100] sm:$0xff]  ;;  %v2364_v52 = vld [vmem:[%s4055_s1 + $0x108] sm:$0xff] }
  0x12   :  { %2745 = vmatprep.mubr.msk.f32.mxu1 %vm266_vm2, %v250_v18  ;;  %2771 = vmatprep.mubr.msk.f32.mxu0 %vm266_vm2, %v2330_v19  ;;  %v2345_v49 = vld [vmem:[%s4055_s1 + $0xf8] sm:$0xff]  ;;  %v2396_v51 = vld [vmem:[%s4055_s1 + $0x180] sm:$0xff]  ;;  %v2397_v53 = vld [vmem:[%s4055_s1 + $0x188] sm:$0xff] }
  0x13   :  { %v2365_v54 = vld [vmem:[%s4055_s1 + $0x110] sm:$0xff]  ;;  %v2366_v56 = vld [vmem:[%s4055_s1 + $0x118] sm:$0xff]  ;;  %v2367_v58 = vld [vmem:[%s4055_s1 + $0x120] sm:$0xff] }
  0x14   :  { %v2398_v55 = vld [vmem:[%s4055_s1 + $0x190] sm:$0xff]  ;;  %v2399_v57 = vld [vmem:[%s4055_s1 + $0x198] sm:$0xff]  ;;  %v2400_v59 = vld [vmem:[%s4055_s1 + $0x1a0] sm:$0xff] }
  0x15   :  { %2746 = vmatmul.mubr.msk.f32.vlgmr.msra.gmra.mrb[8].mxu1 %vm266_vm2, %v251_v20  ;;  %2772 = vmatmul.mubr.msk.f32.vlgmr.msra.gmra.mrb[8].mxu0 %vm266_vm2, %v2331_v21  ;;  %v2368_v60 = vld [vmem:[%s4055_s1 + $0x128] sm:$0xff]  ;;  %v2369_v62 = vld [vmem:[%s4055_s1 + $0x130] sm:$0xff]  ;;  %v2370_v0 = vld [vmem:[%s4055_s1 + $0x138] sm:$0xff] }
  0x16   :  { %2796 = vmatpush3.msk.msra.mxu1 %vm315_vm1, %v3048_v5  ;;  %2748 = vmatprep.mubr.msk.f32.mxu1 %vm266_vm2, %v252_v22  ;;  %v2401_v61 = vld [vmem:[%s4055_s1 + $0x1a8] sm:$0xff]  ;;  %v2402_v63 = vld [vmem:[%s4055_s1 + $0x1b0] sm:$0xff]  ;;  %v2403_v1 = vld [vmem:[%s4055_s1 + $0x1b8] sm:$0xff] }
  0x17   :  { %2774 = vmatprep.mubr.msk.f32.mxu0 %vm266_vm2, %v2332_v23  ;;  %2822 = vmatpush3.msk.msra.mxu0 %vm315_vm1, %v3048_v5  ;;  %v2371_v2 = vld [vmem:[%s4055_s1 + $0x140] sm:$0xff]  ;;  %v2372_v4 = vld [vmem:[%s4055_s1 + $0x148] sm:$0xff]  ;;  %v2373_v7 = vld [vmem:[%s4055_s1 + $0x150] sm:$0xff] }
  0x18   :  { %2847 = vmatprep.subr.msk.mxu1 %vm315_vm1, %v3048_v5  ;;  %2873 = vmatprep.subr.msk.mxu0 %vm315_vm1, %v3048_v5  ;;  %v2404_v3 = vld [vmem:[%s4055_s1 + $0x1c0] sm:$0xff]  ;;  %v2405_v6 = vld [vmem:[%s4055_s1 + $0x1c8] sm:$0xff]  ;;  %v2406_v8 = vld [vmem:[%s4055_s1 + $0x1d0] sm:$0xff] }
  0x19   :  { %2749 = vmatmul.mubr.msk.f32.gmra.mrb[10].mxu1 %vm266_vm2, %v253_v24  ;;  %2775 = vmatmul.mubr.msk.f32.gmra.mrb[10].mxu0 %vm266_vm2, %v2333_v25  ;;  %v2374_v9 = vld [vmem:[%s4055_s1 + $0x158] sm:$0xff]  ;;  %v2375_v11 = vld [vmem:[%s4055_s1 + $0x160] sm:$0xff]  ;;  %v2376_v13 = vld [vmem:[%s4055_s1 + $0x168] sm:$0xff] }
  0x1a   :  { %2751 = vmatprep.mubr.msk.f32.mxu1 %vm266_vm2, %v254_v26  ;;  %2777 = vmatprep.mubr.msk.f32.mxu0 %vm266_vm2, %v2334_v27  ;;  %v2407_v10 = vld [vmem:[%s4055_s1 + $0x1d8] sm:$0xff]  ;;  %v2408_v12 = vld [vmem:[%s4055_s1 + $0x1e0] sm:$0xff]  ;;  %v2409_v14 = vld [vmem:[%s4055_s1 + $0x1e8] sm:$0xff] }
  0x1b   :  { %v2377_v15 = vld [vmem:[%s4055_s1 + $0x170] sm:$0xff]  ;;  %v2378_v17 = vld [vmem:[%s4055_s1 + $0x178] sm:$0xff]  ;;  %v2429_v19 = vld [vmem:[%s4055_s1 + $0x200] sm:$0xff] }
  0x1c   :  { %v2410_v16 = vld [vmem:[%s4055_s1 + $0x1f0] sm:$0xff]  ;;  %v2411_v18 = vld [vmem:[%s4055_s1 + $0x1f8] sm:$0xff]  ;;  %v2462_v20 = vld [vmem:[%s4055_s1 + $0x280] sm:$0xff] }
  0x1d   :  { %2752 = vmatmul.mubr.msk.f32.gmra.mrb[12].mxu1 %vm266_vm2, %v255_v28  ;;  %2778 = vmatmul.mubr.msk.f32.gmra.mrb[12].mxu0 %vm266_vm2, %v2335_v29  ;;  %v2430_v21 = vld [vmem:[%s4055_s1 + $0x208] sm:$0xff]  ;;  %v2431_v23 = vld [vmem:[%s4055_s1 + $0x210] sm:$0xff]  ;;  %v2432_v25 = vld [vmem:[%s4055_s1 + $0x218] sm:$0xff] }
  0x1e   :  { %2754 = vmatprep.mubr.msk.f32.mxu1 %vm266_vm2, %v256_v30  ;;  %2780 = vmatprep.mubr.msk.f32.mxu0 %vm266_vm2, %v2336_v31  ;;  %v2463_v22 = vld [vmem:[%s4055_s1 + $0x288] sm:$0xff]  ;;  %v2464_v24 = vld [vmem:[%s4055_s1 + $0x290] sm:$0xff]  ;;  %v2465_v26 = vld [vmem:[%s4055_s1 + $0x298] sm:$0xff] }
  0x1f   :  { %v2433_v27 = vld [vmem:[%s4055_s1 + $0x220] sm:$0xff]  ;;  %v2467_v29 = vld [vmem:[%s4055_s1 + $0x2a8] sm:$0xff]  ;;  %v2435_v30 = vld [vmem:[%s4055_s1 + $0x230] sm:$0xff] }
  0x20   :  { %v2466_v28 = vld [vmem:[%s4055_s1 + $0x2a0] sm:$0xff]  ;;  %v2468_v31 = vld [vmem:[%s4055_s1 + $0x2b0] sm:$0xff] }
  0x21   :  { %2755 = vmatmul.mubr.msk.f32.gmra.mrb[14].mxu1 %vm266_vm2, %v257_v32  ;;  %2781 = vmatmul.mubr.msk.f32.gmra.mrb[14].mxu0 %vm266_vm2, %v2337_v33  ;;  %v2436_v32 = vld [vmem:[%s4055_s1 + $0x238] sm:$0xff] }
  0x22   :  { %2757 = vmatprep.mubr.msk.f32.mxu1 %vm266_vm2, %v258_v34  ;;  %2783 = vmatprep.mubr.msk.f32.mxu0 %vm266_vm2, %v2338_v35  ;;  %v2469_v33 = vld [vmem:[%s4055_s1 + $0x2b8] sm:$0xff]  ;;  %v2437_v34 = vld [vmem:[%s4055_s1 + $0x240] sm:$0xff] }
  0x23   :  { %v2470_v35 = vld [vmem:[%s4055_s1 + $0x2c0] sm:$0xff] }
  0x25   :  { %2758 = vmatmul.mubr.msk.f32.gmra.mrb[16].mxu1 %vm266_vm2, %v259_v36  ;;  %2784 = vmatmul.mubr.msk.f32.gmra.mrb[16].mxu0 %vm266_vm2, %v2339_v37  ;;  %v2438_v36 = vld [vmem:[%s4055_s1 + $0x248] sm:$0xff] }
  0x26   :  { %2760 = vmatprep.mubr.msk.f32.mxu1 %vm266_vm2, %v260_v38  ;;  %2786 = vmatprep.mubr.msk.f32.mxu0 %vm266_vm2, %v2340_v39  ;;  %v2471_v37 = vld [vmem:[%s4055_s1 + $0x2c8] sm:$0xff]  ;;  %v2439_v38 = vld [vmem:[%s4055_s1 + $0x250] sm:$0xff] }
  0x27   :  { %v2472_v39 = vld [vmem:[%s4055_s1 + $0x2d0] sm:$0xff] }
  0x29   :  { %2761 = vmatmul.mubr.msk.f32.gmra.mrb[18].mxu1 %vm266_vm2, %v261_v40  ;;  %2787 = vmatmul.mubr.msk.f32.gmra.mrb[18].mxu0 %vm266_vm2, %v2341_v41  ;;  %v2440_v40 = vld [vmem:[%s4055_s1 + $0x258] sm:$0xff] }
  0x2a   :  { %2763 = vmatprep.mubr.msk.f32.mxu1 %vm266_vm2, %v262_v42  ;;  %2789 = vmatprep.mubr.msk.f32.mxu0 %vm266_vm2, %v2342_v43  ;;  %v2473_v41 = vld [vmem:[%s4055_s1 + $0x2d8] sm:$0xff]  ;;  %v2441_v42 = vld [vmem:[%s4055_s1 + $0x260] sm:$0xff] }
  0x2b   :  { %v2474_v43 = vld [vmem:[%s4055_s1 + $0x2e0] sm:$0xff] }
  0x2d   :  { %2764 = vmatmul.mubr.msk.f32.gmra.mrb[20].mxu1 %vm266_vm2, %v263_v44  ;;  %2790 = vmatmul.mubr.msk.f32.gmra.mrb[20].mxu0 %vm266_vm2, %v2343_v45  ;;  %v2442_v44 = vld [vmem:[%s4055_s1 + $0x268] sm:$0xff] }
  0x2e   :  { %2766 = vmatprep.mubr.msk.f32.mxu1 %vm266_vm2, %v264_v46  ;;  %2792 = vmatprep.mubr.msk.f32.mxu0 %vm266_vm2, %v2344_v47  ;;  %v2475_v45 = vld [vmem:[%s4055_s1 + $0x2e8] sm:$0xff]  ;;  %v2443_v46 = vld [vmem:[%s4055_s1 + $0x270] sm:$0xff] }
  0x2f   :  { %v2476_v47 = vld [vmem:[%s4055_s1 + $0x2f0] sm:$0xff] }
  0x31   :  { %2767 = vmatmul.mubr.msk.f32.gmra.mrb[22].mxu1 %vm266_vm2, %v265_v48  ;;  %2793 = vmatmul.mubr.msk.f32.gmra.mrb[22].mxu0 %vm266_vm2, %v2345_v49  ;;  %v2444_v48 = vld [vmem:[%s4055_s1 + $0x278] sm:$0xff] }
  0x32   :  { %2797 = vmatprep.mubr.msk.f32.mxu1 %vm266_vm2, %v2363_v50  ;;  %2823 = vmatprep.mubr.msk.f32.mxu0 %vm266_vm2, %v2396_v51  ;;  %v2477_v49 = vld [vmem:[%s4055_s1 + $0x2f8] sm:$0xff]  ;;  %v2495_v50 = vld [vmem:[%s4055_s1 + $0x300] sm:$0xff] }
  0x33   :  { %v2528_v51 = vld [vmem:[%s4055_s1 + $0x380] sm:$0xff] }
  0x35   :  { %2798 = vmatmul.mubr.msk.f32.vlgmr.msra.gmra.mrb[24].mxu1 %vm266_vm2, %v2364_v52  ;;  %2824 = vmatmul.mubr.msk.f32.vlgmr.msra.gmra.mrb[24].mxu0 %vm266_vm2, %v2397_v53  ;;  %v2496_v52 = vld [vmem:[%s4055_s1 + $0x308] sm:$0xff] }
  0x36   :  { %2848 = vmatpush3.msk.msra.mxu1 %vm315_vm1, %v3048_v5  ;;  %2800 = vmatprep.mubr.msk.f32.mxu1 %vm266_vm2, %v2365_v54  ;;  %v2529_v53 = vld [vmem:[%s4055_s1 + $0x388] sm:$0xff]  ;;  %v2497_v54 = vld [vmem:[%s4055_s1 + $0x310] sm:$0xff] }
  0x37   :  { %2874 = vmatpush3.msk.msra.mxu0 %vm315_vm1, %v3048_v5  ;;  %2826 = vmatprep.mubr.msk.f32.mxu0 %vm266_vm2, %v2398_v55  ;;  %v2530_v55 = vld [vmem:[%s4055_s1 + $0x390] sm:$0xff] }
  0x38   :  { %2899 = vmatprep.subr.msk.mxu1 %vm315_vm1, %v3048_v5  ;;  %2925 = vmatprep.subr.msk.mxu0 %vm315_vm1, %v3048_v5 }
  0x39   :  { %2801 = vmatmul.mubr.msk.f32.gmra.mrb[26].mxu1 %vm266_vm2, %v2366_v56  ;;  %2827 = vmatmul.mubr.msk.f32.gmra.mrb[26].mxu0 %vm266_vm2, %v2399_v57  ;;  %v2498_v56 = vld [vmem:[%s4055_s1 + $0x318] sm:$0xff] }
  0x3a   :  { %2803 = vmatprep.mubr.msk.f32.mxu1 %vm266_vm2, %v2367_v58  ;;  %2829 = vmatprep.mubr.msk.f32.mxu0 %vm266_vm2, %v2400_v59  ;;  %v2531_v57 = vld [vmem:[%s4055_s1 + $0x398] sm:$0xff]  ;;  %v2499_v58 = vld [vmem:[%s4055_s1 + $0x320] sm:$0xff] }
  0x3b   :  { %v2532_v59 = vld [vmem:[%s4055_s1 + $0x3a0] sm:$0xff] }
  0x3d   :  { %2804 = vmatmul.mubr.msk.f32.gmra.mrb[28].mxu1 %vm266_vm2, %v2368_v60  ;;  %2830 = vmatmul.mubr.msk.f32.gmra.mrb[28].mxu0 %vm266_vm2, %v2401_v61  ;;  %v2500_v60 = vld [vmem:[%s4055_s1 + $0x328] sm:$0xff] }
  0x3e   :  { %2806 = vmatprep.mubr.msk.f32.mxu1 %vm266_vm2, %v2369_v62  ;;  %2832 = vmatprep.mubr.msk.f32.mxu0 %vm266_vm2, %v2402_v63  ;;  %v2533_v61 = vld [vmem:[%s4055_s1 + $0x3a8] sm:$0xff]  ;;  %v2501_v62 = vld [vmem:[%s4055_s1 + $0x330] sm:$0xff] }
  0x3f   :  { %v2534_v63 = vld [vmem:[%s4055_s1 + $0x3b0] sm:$0xff] }
  0x41   :  { %2807 = vmatmul.mubr.msk.f32.gmra.mrb[30].mxu1 %vm266_vm2, %v2370_v0  ;;  %2833 = vmatmul.mubr.msk.f32.gmra.mrb[30].mxu0 %vm266_vm2, %v2403_v1  ;;  %v2502_v0 = vld [vmem:[%s4055_s1 + $0x338] sm:$0xff] }
  0x42   :  { %2809 = vmatprep.mubr.msk.f32.mxu1 %vm266_vm2, %v2371_v2  ;;  %2835 = vmatprep.mubr.msk.f32.mxu0 %vm266_vm2, %v2404_v3  ;;  %v2535_v1 = vld [vmem:[%s4055_s1 + $0x3b8] sm:$0xff]  ;;  %v2503_v2 = vld [vmem:[%s4055_s1 + $0x340] sm:$0xff] }
  0x43   :  { %v2536_v3 = vld [vmem:[%s4055_s1 + $0x3c0] sm:$0xff] }
  0x45   :  { %2810 = vmatmul.mubr.msk.f32.gmra.mrb[32].mxu1 %vm266_vm2, %v2372_v4  ;;  %2836 = vmatmul.mubr.msk.f32.gmra.mrb[32].mxu0 %vm266_vm2, %v2405_v6  ;;  %v2504_v4 = vld [vmem:[%s4055_s1 + $0x348] sm:$0xff] }
  0x46   :  { %2812 = vmatprep.mubr.msk.f32.mxu1 %vm266_vm2, %v2373_v7  ;;  %2838 = vmatprep.mubr.msk.f32.mxu0 %vm266_vm2, %v2406_v8  ;;  %v2537_v6 = vld [vmem:[%s4055_s1 + $0x3c8] sm:$0xff]  ;;  %v2505_v7 = vld [vmem:[%s4055_s1 + $0x350] sm:$0xff] }
  0x47   :  { %v2538_v8 = vld [vmem:[%s4055_s1 + $0x3d0] sm:$0xff] }
  0x49   :  { %2813 = vmatmul.mubr.msk.f32.gmra.mrb[34].mxu1 %vm266_vm2, %v2374_v9  ;;  %2839 = vmatmul.mubr.msk.f32.gmra.mrb[34].mxu0 %vm266_vm2, %v2407_v10  ;;  %v2506_v9 = vld [vmem:[%s4055_s1 + $0x358] sm:$0xff] }
  0x4a   :  { %2815 = vmatprep.mubr.msk.f32.mxu1 %vm266_vm2, %v2375_v11  ;;  %2841 = vmatprep.mubr.msk.f32.mxu0 %vm266_vm2, %v2408_v12  ;;  %v2539_v10 = vld [vmem:[%s4055_s1 + $0x3d8] sm:$0xff]  ;;  %v2507_v11 = vld [vmem:[%s4055_s1 + $0x360] sm:$0xff] }
  0x4b   :  { %v2540_v12 = vld [vmem:[%s4055_s1 + $0x3e0] sm:$0xff] }
  0x4d   :  { %2816 = vmatmul.mubr.msk.f32.gmra.mrb[36].mxu1 %vm266_vm2, %v2376_v13  ;;  %2842 = vmatmul.mubr.msk.f32.gmra.mrb[36].mxu0 %vm266_vm2, %v2409_v14  ;;  %v2508_v13 = vld [vmem:[%s4055_s1 + $0x368] sm:$0xff] }
  0x4e   :  { %2818 = vmatprep.mubr.msk.f32.mxu1 %vm266_vm2, %v2377_v15  ;;  %2844 = vmatprep.mubr.msk.f32.mxu0 %vm266_vm2, %v2410_v16  ;;  %v2541_v14 = vld [vmem:[%s4055_s1 + $0x3e8] sm:$0xff]  ;;  %v2509_v15 = vld [vmem:[%s4055_s1 + $0x370] sm:$0xff] }
  0x4f   :  { %v2542_v16 = vld [vmem:[%s4055_s1 + $0x3f0] sm:$0xff] }
  0x51   :  { %2819 = vmatmul.mubr.msk.f32.gmra.mrb[38].mxu1 %vm266_vm2, %v2378_v17  ;;  %2845 = vmatmul.mubr.msk.f32.gmra.mrb[38].mxu0 %vm266_vm2, %v2411_v18  ;;  %v2510_v17 = vld [vmem:[%s4055_s1 + $0x378] sm:$0xff] }
  0x52   :  { %2849 = vmatprep.mubr.msk.f32.mxu1 %vm266_vm2, %v2429_v19  ;;  %2875 = vmatprep.mubr.msk.f32.mxu0 %vm266_vm2, %v2462_v20  ;;  %v2543_v18 = vld [vmem:[%s4055_s1 + $0x3f8] sm:$0xff] }
  0x55   :  { %2850 = vmatmul.mubr.msk.f32.vlgmr.msra.gmra.mrb[40].mxu1 %vm266_vm2, %v2430_v21  ;;  %2876 = vmatmul.mubr.msk.f32.vlgmr.msra.gmra.mrb[40].mxu0 %vm266_vm2, %v2463_v22 }
  0x56   :  { %2900 = vmatpush3.msk.msra.mxu1 %vm315_vm1, %v3048_v5  ;;  %2852 = vmatprep.mubr.msk.f32.mxu1 %vm266_vm2, %v2431_v23 }
  0x57   :  { %2926 = vmatpush3.msk.msra.mxu0 %vm315_vm1, %v3048_v5  ;;  %2878 = vmatprep.mubr.msk.f32.mxu0 %vm266_vm2, %v2464_v24  ;;  %v2434_v5 = vld [vmem:[%s4055_s1 + $0x228] sm:$0xff] }
  0x59   :  { %2853 = vmatmul.mubr.msk.f32.gmra.mrb[42].mxu1 %vm266_vm2, %v2432_v25  ;;  %2879 = vmatmul.mubr.msk.f32.gmra.mrb[42].mxu0 %vm266_vm2, %v2465_v26 }
  0x5a   :  { %2855 = vmatprep.mubr.msk.f32.mxu1 %vm266_vm2, %v2433_v27  ;;  %2881 = vmatprep.mubr.msk.f32.mxu0 %vm266_vm2, %v2466_v28 }
  0x5d   :  { %2856 = vmatmul.mubr.msk.f32.gmra.mrb[44].mxu1 %vm266_vm2, %v2434_v5  ;;  %2882 = vmatmul.mubr.msk.f32.gmra.mrb[44].mxu0 %vm266_vm2, %v2467_v29 }
  0x5e   :  { %2858 = vmatprep.mubr.msk.f32.mxu1 %vm266_vm2, %v2435_v30  ;;  %2884 = vmatprep.mubr.msk.f32.mxu0 %vm266_vm2, %v2468_v31 }
  0x61   :  { %2859 = vmatmul.mubr.msk.f32.gmra.mrb[46].mxu1 %vm266_vm2, %v2436_v32  ;;  %2885 = vmatmul.mubr.msk.f32.gmra.mrb[46].mxu0 %vm266_vm2, %v2469_v33 }
  0x62   :  { %2861 = vmatprep.mubr.msk.f32.mxu1 %vm266_vm2, %v2437_v34  ;;  %2887 = vmatprep.mubr.msk.f32.mxu0 %vm266_vm2, %v2470_v35 }
  0x65   :  { %2862 = vmatmul.mubr.msk.f32.gmra.mrb[48].mxu1 %vm266_vm2, %v2438_v36  ;;  %2888 = vmatmul.mubr.msk.f32.gmra.mrb[48].mxu0 %vm266_vm2, %v2471_v37 }
  0x66   :  { %2864 = vmatprep.mubr.msk.f32.mxu1 %vm266_vm2, %v2439_v38  ;;  %2890 = vmatprep.mubr.msk.f32.mxu0 %vm266_vm2, %v2472_v39 }
  0x69   :  { %2865 = vmatmul.mubr.msk.f32.gmra.mrb[50].mxu1 %vm266_vm2, %v2440_v40  ;;  %2891 = vmatmul.mubr.msk.f32.gmra.mrb[50].mxu0 %vm266_vm2, %v2473_v41 }
  0x6a   :  { %2867 = vmatprep.mubr.msk.f32.mxu1 %vm266_vm2, %v2441_v42  ;;  %2893 = vmatprep.mubr.msk.f32.mxu0 %vm266_vm2, %v2474_v43 }
  0x6d   :  { %2868 = vmatmul.mubr.msk.f32.gmra.mrb[52].mxu1 %vm266_vm2, %v2442_v44  ;;  %2894 = vmatmul.mubr.msk.f32.gmra.mrb[52].mxu0 %vm266_vm2, %v2475_v45 }
  0x6e   :  { %2870 = vmatprep.mubr.msk.f32.mxu1 %vm266_vm2, %v2443_v46  ;;  %2896 = vmatprep.mubr.msk.f32.mxu0 %vm266_vm2, %v2476_v47 }
  0x71   :  { %2871 = vmatmul.mubr.msk.f32.gmra.mrb[54].mxu1 %vm266_vm2, %v2444_v48  ;;  %2897 = vmatmul.mubr.msk.f32.gmra.mrb[54].mxu0 %vm266_vm2, %v2477_v49 }
  0x72   :  { %2901 = vmatprep.mubr.msk.f32.mxu1 %vm266_vm2, %v2495_v50  ;;  %2927 = vmatprep.mubr.msk.f32.mxu0 %vm266_vm2, %v2528_v51 }
  0x75   :  { %2902 = vmatmul.mubr.msk.f32.vlgmr.msra.gmra.mrb[56].mxu1 %vm266_vm2, %v2496_v52  ;;  %2928 = vmatmul.mubr.msk.f32.vlgmr.msra.gmra.mrb[56].mxu0 %vm266_vm2, %v2529_v53 }
  0x76   :  { %2904 = vmatprep.mubr.msk.f32.mxu1 %vm266_vm2, %v2497_v54  ;;  %2930 = vmatprep.mubr.msk.f32.mxu0 %vm266_vm2, %v2530_v55 }
  0x79   :  { %2905 = vmatmul.mubr.msk.f32.gmra.mrb[58].mxu1 %vm266_vm2, %v2498_v56  ;;  %2931 = vmatmul.mubr.msk.f32.gmra.mrb[58].mxu0 %vm266_vm2, %v2531_v57 }
  0x7a   :  { %2907 = vmatprep.mubr.msk.f32.mxu1 %vm266_vm2, %v2499_v58  ;;  %2933 = vmatprep.mubr.msk.f32.mxu0 %vm266_vm2, %v2532_v59 }
  0x7d   :  { %2908 = vmatmul.mubr.msk.f32.gmra.mrb[60].mxu1 %vm266_vm2, %v2500_v60  ;;  %2934 = vmatmul.mubr.msk.f32.gmra.mrb[60].mxu0 %vm266_vm2, %v2533_v61  ;;  %v13_v60 = vstv %s4056_s7 }
  0x7e   :  { %2910 = vmatprep.mubr.msk.f32.mxu1 %vm266_vm2, %v2501_v62  ;;  %2936 = vmatprep.mubr.msk.f32.mxu0 %vm266_vm2, %v2534_v63  ;;  %14 = vst [vmem:[#allocation2] sm:$0x1] %v13_v60 }
  0x81   :  { %2911 = vmatmul.mubr.msk.f32.gmra.mrb[62].mxu1 %vm266_vm2, %v2502_v0  ;;  %2937 = vmatmul.mubr.msk.f32.gmra.mrb[62].mxu0 %vm266_vm2, %v2535_v1 }
  0x82   :  { %2913 = vmatprep.mubr.msk.f32.mxu1 %vm266_vm2, %v2503_v2  ;;  %2939 = vmatprep.mubr.msk.f32.mxu0 %vm266_vm2, %v2536_v3 }
  0x85   :  { %2914 = vmatmul.mubr.msk.f32.gmra.mrb[64].mxu1 %vm266_vm2, %v2504_v4  ;;  %2940 = vmatmul.mubr.msk.f32.gmra.mrb[64].mxu0 %vm266_vm2, %v2537_v6 }
  0x86   :  { %2916 = vmatprep.mubr.msk.f32.mxu1 %vm266_vm2, %v2505_v7  ;;  %2942 = vmatprep.mubr.msk.f32.mxu0 %vm266_vm2, %v2538_v8 }
  0x89   :  { %2917 = vmatmul.mubr.msk.f32.gmra.mrb[66].mxu1 %vm266_vm2, %v2506_v9  ;;  %2943 = vmatmul.mubr.msk.f32.gmra.mrb[66].mxu0 %vm266_vm2, %v2539_v10 }
  0x8a   :  { %2919 = vmatprep.mubr.msk.f32.mxu1 %vm266_vm2, %v2507_v11  ;;  %2945 = vmatprep.mubr.msk.f32.mxu0 %vm266_vm2, %v2540_v12 }
  0x8d   :  { %2920 = vmatmul.mubr.msk.f32.gmra.mrb[68].mxu1 %vm266_vm2, %v2508_v13  ;;  %2946 = vmatmul.mubr.msk.f32.gmra.mrb[68].mxu0 %vm266_vm2, %v2541_v14 }
  0x8e   :  { %2922 = vmatprep.mubr.msk.f32.mxu1 %vm266_vm2, %v2509_v15  ;;  %2948 = vmatprep.mubr.msk.f32.mxu0 %vm266_vm2, %v2542_v16 }
  0x91   :  { %2923 = vmatmul.mubr.msk.f32.gmra.mrb[70].mxu1 %vm266_vm2, %v2510_v17  ;;  %2949 = vmatmul.mubr.msk.f32.gmra.mrb[70].mxu0 %vm266_vm2, %v2543_v18 }
  0xd8   :  { %v3646_v19 = vpop.f32.mrb[0].mxu1  ;;  %v3648_v20 = vpop.f32.mrb[0].mxu0 }
  0xd9   :  { %v3650_v21 = vpop.f32.mrb[1].mxu1  ;;  %v3652_v22 = vpop.f32.mrb[1].mxu0 }
  0xdc   :  { %v3654_v23 = vpop.f32.mrb[2].mxu1  ;;  %v3656_v24 = vpop.f32.mrb[2].mxu0 }
  0xdd   :  { %v3658_v25 = vpop.f32.mrb[3].mxu1  ;;  %v3660_v26 = vpop.f32.mrb[3].mxu0 }
  0xe0   :  { %v3662_v27 = vpop.f32.mrb[4].mxu1  ;;  %v3664_v28 = vpop.f32.mrb[4].mxu0 }
  0xe1   :  { %v3666_v5 = vpop.f32.mrb[5].mxu1  ;;  %v3668_v29 = vpop.f32.mrb[5].mxu0 }
  0xe4   :  { %v3670_v30 = vpop.f32.mrb[6].mxu1  ;;  %v3672_v31 = vpop.f32.mrb[6].mxu0 }
  0xe5   :  { %v3674_v32 = vpop.f32.mrb[7].mxu1  ;;  %v3676_v33 = vpop.f32.mrb[7].mxu0 }
  0xe8   :  { %v2747_v34 = vpop.f32.mrb[8].mxu1  ;;  %v2773_v35 = vpop.f32.mrb[8].mxu0 }
  0xe9   :  { %v675_v36 = vmax.f32 %v2747_v34, %v2773_v35  ;;  %v385_v37 = vpop.f32.mrb[9].mxu1  ;;  %v595_v38 = vpop.f32.mrb[9].mxu0 }
  0xea   :  { %v674_v39 = vmax.f32 %v385_v37, %v595_v38 }
  0xec   :  { %v2750_v40 = vpop.f32.mrb[10].mxu1  ;;  %v2776_v41 = vpop.f32.mrb[10].mxu0 }
  0xed   :  { %v677_v42 = vmax.f32 %v2750_v40, %v2776_v41  ;;  %v395_v43 = vpop.f32.mrb[11].mxu1  ;;  %v605_v44 = vpop.f32.mrb[11].mxu0 }
  0xee   :  { %v676_v45 = vmax.f32 %v395_v43, %v605_v44 }
  0xf0   :  { %v2753_v46 = vpop.f32.mrb[12].mxu1  ;;  %v2779_v47 = vpop.f32.mrb[12].mxu0 }
  0xf1   :  { %v679_v48 = vmax.f32 %v2753_v46, %v2779_v47  ;;  %v405_v49 = vpop.f32.mrb[13].mxu1  ;;  %v615_v50 = vpop.f32.mrb[13].mxu0 }
  0xf2   :  { %v678_v51 = vmax.f32 %v405_v49, %v615_v50 }
  0xf4   :  { %v2756_v52 = vpop.f32.mrb[14].mxu1  ;;  %v2782_v53 = vpop.f32.mrb[14].mxu0 }
  0xf5   :  { %v681_v54 = vmax.f32 %v2756_v52, %v2782_v53  ;;  %v415_v55 = vpop.f32.mrb[15].mxu1  ;;  %v625_v56 = vpop.f32.mrb[15].mxu0 }
  0xf6   :  { %v680_v57 = vmax.f32 %v415_v55, %v625_v56 }
  0xf8   :  { %v2759_v58 = vpop.f32.mrb[16].mxu1  ;;  %v2785_v59 = vpop.f32.mrb[16].mxu0 }
  0xf9   :  { %v683_v61 = vmax.f32 %v2759_v58, %v2785_v59  ;;  %v425_v62 = vpop.f32.mrb[17].mxu1  ;;  %v635_v63 = vpop.f32.mrb[17].mxu0 }
  0xfa   :  { %v682_v0 = vmax.f32 %v425_v62, %v635_v63 }
  0xfc   :  { %v2762_v1 = vpop.f32.mrb[18].mxu1  ;;  %v2788_v2 = vpop.f32.mrb[18].mxu0 }
  0xfd   :  { %v685_v3 = vmax.f32 %v2762_v1, %v2788_v2  ;;  %v435_v4 = vpop.f32.mrb[19].mxu1  ;;  %v645_v6 = vpop.f32.mrb[19].mxu0 }
  0xfe   :  { %v684_v7 = vmax.f32 %v435_v4, %v645_v6 }
 0x100   :  { %v3681_v8 = vpop.f32.mrb[20].mxu1  ;;  %v2791_v9 = vpop.f32.mrb[20].mxu0 }
 0x101   :  { %v687_v10 = vmax.f32 %v3681_v8, %v2791_v9  ;;  %v3684_v11 = vpop.f32.mrb[21].mxu1  ;;  %v655_v12 = vpop.f32.mrb[21].mxu0 }
 0x102   :  { %v686_v13 = vmax.f32 %v3684_v11, %v655_v12 }
 0x104   :  { %v3687_v14 = vpop.f32.mrb[22].mxu1  ;;  %v3689_v15 = vpop.f32.mrb[22].mxu0 }
 0x105   :  { %v689_v16 = vmax.f32 %v3687_v14, %v3689_v15  ;;  %v3693_v17 = vpop.f32.mrb[23].mxu1  ;;  %v3695_v18 = vpop.f32.mrb[23].mxu0 }
 0x106   :  { %v688_v34 = vmax.f32 %v3693_v17, %v3695_v18 }
 0x108   :  { %v2799_v35 = vpop.f32.mrb[24].mxu1  ;;  %v3699_v37 = vpop.f32.mrb[24].mxu0 }
 0x109   :  { %v3701_v38 = vmax.f32 %v675_v36, %v2799_v35  ;;  %v821_v40 = vpop.f32.mrb[25].mxu1  ;;  %v3703_v41 = vpop.f32.mrb[25].mxu0 }
 0x10a   :  { %v3705_v43 = vmax.f32 %v674_v39, %v821_v40 }
 0x10b   :  { %v1127_v44 = vmax.f32 %v3701_v38, %v3699_v37 }
 0x10c   :  { %v1126_v46 = vmax.f32 %v3705_v43, %v3703_v41  ;;  %v2802_v47 = vpop.f32.mrb[26].mxu1  ;;  %v3711_v49 = vpop.f32.mrb[26].mxu0 }
 0x10d   :  { %v3713_v50 = vmax.f32 %v677_v42, %v2802_v47  ;;  %v831_v52 = vpop.f32.mrb[27].mxu1  ;;  %v3715_v53 = vpop.f32.mrb[27].mxu0 }
 0x10e   :  { %v3717_v36 = vmax.f32 %v676_v45, %v831_v52 }
 0x10f   :  { %v1129_v39 = vmax.f32 %v3713_v50, %v3711_v49 }
 0x110   :  { %v1128_v55 = vmax.f32 %v3717_v36, %v3715_v53  ;;  %v2805_v56 = vpop.f32.mrb[28].mxu1  ;;  %v3723_v58 = vpop.f32.mrb[28].mxu0 }
 0x111   :  { %v3725_v59 = vmax.f32 %v679_v48, %v2805_v56  ;;  %v841_v60 = vpop.f32.mrb[29].mxu1  ;;  %v3727_v62 = vpop.f32.mrb[29].mxu0 }
 0x112   :  { %v3729_v42 = vmax.f32 %v678_v51, %v841_v60 }
 0x113   :  { %v1131_v45 = vmax.f32 %v3725_v59, %v3723_v58 }
 0x114   :  { %v1130_v63 = vmax.f32 %v3729_v42, %v3727_v62  ;;  %v2808_v1 = vpop.f32.mrb[30].mxu1  ;;  %v3735_v2 = vpop.f32.mrb[30].mxu0 }
 0x115   :  { %v3737_v4 = vmax.f32 %v681_v54, %v2808_v1  ;;  %v851_v6 = vpop.f32.mrb[31].mxu1  ;;  %v3739_v8 = vpop.f32.mrb[31].mxu0 }
 0x116   :  { %v3741_v48 = vmax.f32 %v680_v57, %v851_v6 }
 0x117   :  { %v1133_v51 = vmax.f32 %v3737_v4, %v3735_v2 }
 0x118   :  { %v1132_v9 = vmax.f32 %v3741_v48, %v3739_v8  ;;  %v2811_v11 = vpop.f32.mrb[32].mxu1  ;;  %v3747_v12 = vpop.f32.mrb[32].mxu0 }
 0x119   :  { %v3749_v14 = vmax.f32 %v683_v61, %v2811_v11  ;;  %v861_v15 = vpop.f32.mrb[33].mxu1  ;;  %v3751_v17 = vpop.f32.mrb[33].mxu0 }
 0x11a   :  { %v3753_v54 = vmax.f32 %v682_v0, %v861_v15 }
 0x11b   :  { %v1135_v57 = vmax.f32 %v3749_v14, %v3747_v12 }
 0x11c   :  { %v1134_v18 = vmax.f32 %v3753_v54, %v3751_v17  ;;  %v2814_v35 = vpop.f32.mrb[34].mxu1  ;;  %v3759_v37 = vpop.f32.mrb[34].mxu0 }
 0x11d   :  { %v3761_v38 = vmax.f32 %v685_v3, %v2814_v35  ;;  %v871_v40 = vpop.f32.mrb[35].mxu1  ;;  %v3763_v41 = vpop.f32.mrb[35].mxu0 }
 0x11e   :  { %v3765_v61 = vmax.f32 %v684_v7, %v871_v40 }
 0x11f   :  { %v1137_v0 = vmax.f32 %v3761_v38, %v3759_v37 }
 0x120   :  { %v1136_v43 = vmax.f32 %v3765_v61, %v3763_v41  ;;  %v2817_v47 = vpop.f32.mrb[36].mxu1  ;;  %v3771_v49 = vpop.f32.mrb[36].mxu0 }
 0x121   :  { %v3773_v50 = vmax.f32 %v687_v10, %v2817_v47  ;;  %v881_v52 = vpop.f32.mrb[37].mxu1  ;;  %v3775_v53 = vpop.f32.mrb[37].mxu0 }
 0x122   :  { %v3777_v3 = vmax.f32 %v686_v13, %v881_v52 }
 0x123   :  { %v1139_v7 = vmax.f32 %v3773_v50, %v3771_v49 }
 0x124   :  { %v1138_v36 = vmax.f32 %v3777_v3, %v3775_v53  ;;  %v2820_v56 = vpop.f32.mrb[38].mxu1  ;;  %v3783_v58 = vpop.f32.mrb[38].mxu0 }
 0x125   :  { %v3785_v59 = vmax.f32 %v689_v16, %v2820_v56  ;;  %v891_v60 = vpop.f32.mrb[39].mxu1  ;;  %v3787_v62 = vpop.f32.mrb[39].mxu0 }
 0x126   :  { %v3789_v10 = vmax.f32 %v688_v34, %v891_v60 }
 0x127   :  { %v1141_v13 = vmax.f32 %v3785_v59, %v3783_v58 }
 0x128   :  { %v1140_v42 = vmax.f32 %v3789_v10, %v3787_v62  ;;  %v2851_v1 = vpop.f32.mrb[40].mxu1  ;;  %v3795_v2 = vpop.f32.mrb[40].mxu0 }
 0x129   :  { %v3797_v4 = vmax.f32 %v1127_v44, %v2851_v1  ;;  %v1273_v6 = vpop.f32.mrb[41].mxu1  ;;  %v3799_v8 = vpop.f32.mrb[41].mxu0 }
 0x12a   :  { %v3801_v16 = vmax.f32 %v1126_v46, %v1273_v6 }
 0x12b   :  { %v1579_v34 = vmax.f32 %v3797_v4, %v3795_v2 }
 0x12c   :  { %v1578_v48 = vmax.f32 %v3801_v16, %v3799_v8  ;;  %v2854_v11 = vpop.f32.mrb[42].mxu1  ;;  %v3807_v12 = vpop.f32.mrb[42].mxu0 }
 0x12d   :  { %v3809_v14 = vmax.f32 %v1129_v39, %v2854_v11  ;;  %v1283_v15 = vpop.f32.mrb[43].mxu1  ;;  %v3811_v17 = vpop.f32.mrb[43].mxu0 }
 0x12e   :  { %v3813_v44 = vmax.f32 %v1128_v55, %v1283_v15 }
 0x12f   :  { %v1581_v46 = vmax.f32 %v3809_v14, %v3807_v12 }
 0x130   :  { %v1580_v54 = vmax.f32 %v3813_v44, %v3811_v17  ;;  %v2857_v35 = vpop.f32.mrb[44].mxu1  ;;  %v3819_v37 = vpop.f32.mrb[44].mxu0 }
 0x131   :  { %v3821_v38 = vmax.f32 %v1131_v45, %v2857_v35  ;;  %v1293_v40 = vpop.f32.mrb[45].mxu1  ;;  %v3823_v41 = vpop.f32.mrb[45].mxu0 }
 0x132   :  { %v3825_v39 = vmax.f32 %v1130_v63, %v1293_v40 }
 0x133   :  { %v1583_v55 = vmax.f32 %v3821_v38, %v3819_v37 }
 0x134   :  { %v2860_v47 = vpop.f32.mrb[46].mxu1  ;;  %v3831_v49 = vpop.f32.mrb[46].mxu0 }
 0x135   :  { %v3833_v50 = vmax.f32 %v1133_v51, %v2860_v47  ;;  %v1303_v52 = vpop.f32.mrb[47].mxu1  ;;  %v3835_v53 = vpop.f32.mrb[47].mxu0 }
 0x136   :  { %v3837_v45 = vmax.f32 %v1132_v9, %v1303_v52 }
 0x138   :  { %v2863_v56 = vpop.f32.mrb[48].mxu1  ;;  %v3843_v58 = vpop.f32.mrb[48].mxu0 }
 0x139   :  { %v3845_v59 = vmax.f32 %v1135_v57, %v2863_v56  ;;  %v1313_v60 = vpop.f32.mrb[49].mxu1  ;;  %v3847_v62 = vpop.f32.mrb[49].mxu0 }
 0x13a   :  { %v3849_v51 = vmax.f32 %v1134_v18, %v1313_v60 }
 0x13c   :  { %v2866_v1 = vpop.f32.mrb[50].mxu1  ;;  %v3855_v2 = vpop.f32.mrb[50].mxu0 }
 0x13d   :  { %v3857_v4 = vmax.f32 %v1137_v0, %v2866_v1  ;;  %v1323_v6 = vpop.f32.mrb[51].mxu1  ;;  %v3859_v11 = vpop.f32.mrb[51].mxu0 }
 0x13e   :  { %v3861_v57 = vmax.f32 %v1136_v43, %v1323_v6 }
 0x140   :  { %v2869_v35 = vpop.f32.mrb[52].mxu1  ;;  %v3867_v40 = vpop.f32.mrb[52].mxu0 }
 0x141   :  { %v3869_v47 = vmax.f32 %v1139_v7, %v2869_v35  ;;  %v1333_v52 = vpop.f32.mrb[53].mxu1  ;;  %v3871_v56 = vpop.f32.mrb[53].mxu0 }
 0x142   :  { %v3873_v0 = vmax.f32 %v1138_v36, %v1333_v52 }
 0x144   :  { %v2872_v1 = vpop.f32.mrb[54].mxu1  ;;  %v3879_v6 = vpop.f32.mrb[54].mxu0 }
 0x145   :  { %v3881_v15 = vmax.f32 %v1141_v13, %v2872_v1  ;;  %v1343_v18 = vpop.f32.mrb[55].mxu1  ;;  %v3883_v10 = vpop.f32.mrb[55].mxu0  ;;  %v3894_v13 = vld [vmem:[%s4057_s3] ss:$0 sm:$0xff] }
 0x146   :  { %v3885_v7 = vmax.f32 %v1140_v42, %v1343_v18  ;;  %v177_v18 = vadd.f32 %v3648_v20, %v3894_v13  ;;  %v172_v35 = vadd.f32 %v3894_v13, %v3652_v22  ;;  %v192_v38 = vadd.f32 %v3894_v13, %v3668_v29 }
 0x147   :  { %v212_v29 = vadd.f32 %v3894_v13, %v3650_v21 }
 0x148   :  { %v2903_v52 = vpop.f32.mrb[56].mxu1  ;;  %v2929_v43 = vpop.f32.mrb[56].mxu0 }
 0x149   :  { %v1805_v9 = vmax.f32 %v1579_v34, %v2903_v52  ;;  %v1725_v60 = vpop.f32.mrb[57].mxu1  ;;  %v1951_v3 = vpop.f32.mrb[57].mxu0  ;;  %v3906_v34 = vld [vmem:[%s4058_s5] ss:$0 sm:$0xff] }
 0x14a   :  { %v1804_v42 = vmax.f32 %v1578_v48, %v1725_v60  ;;  %v182_v60 = vadd.f32 %v3894_v13, %v3660_v26  ;;  %v217_v26 = vadd.f32 %v3646_v19, %v3894_v13 }
 0x14b   :  { %v2031_v1 = vmax.f32 %v1805_v9, %v2929_v43 }
 0x14c   :  { %v2030_v36 = vmax.f32 %v1804_v42, %v1951_v3  ;;  %v2906_v52 = vpop.f32.mrb[58].mxu1  ;;  %v2932_v63 = vpop.f32.mrb[58].mxu0  ;;  %v187_v3 = vadd.f32 %v3656_v24, %v3894_v13 }
 0x14d   :  { %v2047_v61 = vadd.f32 %v2031_v1, %v177_v18  ;;  %v1807_v8 = vmax.f32 %v1581_v46, %v2906_v52  ;;  %v1735_v16 = vpop.f32.mrb[59].mxu1  ;;  %v1961_v48 = vpop.f32.mrb[59].mxu0  ;;  %v197_v52 = vadd.f32 %v3664_v28, %v3894_v13 }
 0x14e   :  { %v2046_v20 = vadd.f32 %v2030_v36, %v172_v35  ;;  %v1806_v22 = vmax.f32 %v1580_v54, %v1735_v16  ;;  %v3923_v36 = vld [vmem:[%s4059_s6] ss:$0 sm:$0xff]  ;;  %v4061_v35 = vmax.f32 %v3825_v39, %v3823_v41 }
 0x14f   :  { %v2033_v9 = vmax.f32 %v1807_v8, %v2932_v63  ;;  %v2070_v43 = vadd.f32 %v3906_v34, %v2047_v61 }
 0x150   :  { %v2069_v42 = vadd.f32 %v3906_v34, %v2046_v20  ;;  %v2032_v12 = vmax.f32 %v1806_v22, %v1961_v48  ;;  %v2909_v14 = vpop.f32.mrb[60].mxu1  ;;  %v2935_v46 = vpop.f32.mrb[60].mxu0  ;;  %v4062_v22 = vmax.f32 %v3833_v50, %v3831_v49  ;;  %v202_v49 = vadd.f32 %v3894_v13, %v3676_v33 }
 0x151   :  { %v2049_v17 = vadd.f32 %v2033_v9, %v187_v3  ;;  %v1809_v24 = vmax.f32 %v1583_v55, %v2909_v14  ;;  %v1745_v44 = vpop.f32.mrb[61].mxu1  ;;  %v1971_v54 = vpop.f32.mrb[61].mxu0  ;;  %v2086_v61 = vmax.f32 %v2070_v43, 0.0 }
 0x152   :  { %v2048_v63 = vadd.f32 %v2032_v12, %v182_v60  ;;  %v1808_v18 = vmax.f32 %v4061_v35, %v1745_v44  ;;  %v2085_v1 = vmax.f32 %v2069_v42, 0.0  ;;  %v4063_v12 = vmax.f32 %v3837_v45, %v3835_v53 }
 0x153   :  { %v2072_v8 = vadd.f32 %v3906_v34, %v2049_v17  ;;  %v2035_v16 = vmax.f32 %v1809_v24, %v2935_v46  ;;  %v2109_v37 = vmul.f32 %v3923_v36, %v2086_v61  ;;  %v207_v17 = vadd.f32 %v3672_v31, %v3894_v13 }
 0x154   :  { %v2034_v55 = vmax.f32 %v1808_v18, %v1971_v54  ;;  %v2912_v48 = vpop.f32.mrb[62].mxu1  ;;  %v2938_v19 = vpop.f32.mrb[62].mxu0  ;;  %v2108_v20 = vmul.f32 %v3923_v36, %v2085_v1  ;;  %v2071_v41 = vadd.f32 %v3906_v34, %v2048_v63  ;;  %v4064_v35 = vmax.f32 %v3845_v59, %v3843_v58 }
 0x155   :  { %v2051_v39 = vadd.f32 %v2035_v16, %v197_v52  ;;  %v1811_v28 = vmax.f32 %v4062_v22, %v2912_v48  ;;  %v1755_v3 = vpop.f32.mrb[63].mxu1  ;;  %v2127_v9 = vsel %vm56_vm0, %v2109_v37, 0.0  ;;  %v1981_v43 = vpop.f32.mrb[63].mxu0  ;;  %v2088_v60 = vmax.f32 %v2072_v8, 0.0 }
 0x156   :  { %v2050_v42 = vadd.f32 %v2034_v55, %v192_v38  ;;  %v1810_v14 = vmax.f32 %v4063_v12, %v1755_v3  ;;  %2128 = vadd.xlane.f32.xlu0 %v2127_v9  ;;  %v2087_v46 = vmax.f32 %v2071_v41, 0.0  ;;  %v2124_v33 = vsel %vm56_vm0, %v2108_v20, 0.0 }
 0x157   :  { %v2074_v50 = vadd.f32 %v3906_v34, %v2051_v39  ;;  %v2037_v24 = vmax.f32 %v1811_v28, %v2938_v19  ;;  %v2111_v53 = vmul.f32 %v3923_v36, %v2088_v60  ;;  %v4065_v16 = vmax.f32 %v3849_v51, %v3847_v62 }
 0x158   :  { %v2073_v44 = vadd.f32 %v3906_v34, %v2050_v42  ;;  %v2036_v54 = vmax.f32 %v1810_v14, %v1981_v43  ;;  %v2915_v21 = vpop.f32.mrb[64].mxu1  ;;  %v2941_v61 = vpop.f32.mrb[64].mxu0  ;;  %v2110_v63 = vmul.f32 %v3923_v36, %v2087_v46  ;;  %v227_v48 = vadd.f32 %v3654_v23, %v3894_v13 }
 0x159   :  { %v2053_v45 = vadd.f32 %v2037_v24, %v207_v17  ;;  %v1813_v31 = vmax.f32 %v4064_v35, %v2915_v21  ;;  %v1765_v18 = vpop.f32.mrb[65].mxu1  ;;  %v1991_v1 = vpop.f32.mrb[65].mxu0  ;;  %v2090_v52 = vmax.f32 %v2074_v50, 0.0  ;;  %v222_v58 = vadd.f32 %v3894_v13, %v3658_v25 }
 0x15a   :  { %v2052_v8 = vadd.f32 %v2036_v54, %v202_v49  ;;  %v1812_v37 = vmax.f32 %v4065_v16, %v1765_v18  ;;  %2125 = vadd.xlane.f32.xlu0 %v2124_v33  ;;  %v2130_v38 = vsel %vm56_vm0, %v2110_v63, 0.0  ;;  %v2089_v55 = vmax.f32 %v2073_v44, 0.0 }
 0x15b   :  { %v2076_v59 = vadd.f32 %v3906_v34, %v2053_v45  ;;  %v2039_v19 = vmax.f32 %v1813_v31, %v2941_v61  ;;  %2131 = vadd.xlane.f32.xlu1 %v2130_v38  ;;  %v2133_v51 = vsel %vm56_vm0, %v2111_v53, 0.0  ;;  %v4066_v23 = vmax.f32 %v3857_v4, %v3855_v2 }
 0x15c   :  { %v2075_v20 = vadd.f32 %v3906_v34, %v2052_v8  ;;  %v2038_v41 = vmax.f32 %v1812_v37, %v1991_v1  ;;  %v2918_v39 = vpop.f32.mrb[66].mxu1  ;;  %v2944_v62 = vpop.f32.mrb[66].mxu0  ;;  %v2112_v22 = vmul.f32 %v3923_v36, %v2089_v55  ;;  %v2113_v43 = vmul.f32 %v3923_v36, %v2090_v52 }
 0x15d   :  { %v2055_v28 = vadd.f32 %v2039_v19, %v217_v26  ;;  %v1815_v3 = vmax.f32 %v4066_v23, %v2918_v39  ;;  %v1775_v9 = vpop.f32.mrb[67].mxu1  ;;  %v2001_v25 = vpop.f32.mrb[67].mxu0  ;;  %v2092_v60 = vmax.f32 %v2076_v59, 0.0  ;;  %v4067_v12 = vmax.f32 %v3861_v57, %v3859_v11 }
 0x15e   :  { %v2054_v42 = vadd.f32 %v2038_v41, %v212_v29  ;;  %v2136_v46 = vsel %vm56_vm0, %v2112_v22, 0.0  ;;  %v2091_v17 = vmax.f32 %v2075_v20, 0.0  ;;  %v237_v26 = vadd.f32 %v3662_v27, %v3894_v13 }
 0x15f   :  { %v1814_v14 = vmax.f32 %v4067_v12, %v1775_v9  ;;  %v2078_v49 = vadd.f32 %v3906_v34, %v2055_v28  ;;  %v2041_v2 = vmax.f32 %v1815_v3, %v2944_v62  ;;  %2134 = vadd.xlane.f32.xlu1 %v2133_v51  ;;  %2137 = vadd.xlane.f32.xlu0 %v2136_v46  ;;  %v2139_v63 = vsel %vm56_vm0, %v2113_v43, 0.0 }
 0x160   :  { %v2077_v4 = vadd.f32 %v3906_v34, %v2054_v42  ;;  %v2921_v24 = vpop.f32.mrb[68].mxu1  ;;  %v2947_v29 = vpop.f32.mrb[68].mxu0  ;;  %v2114_v44 = vmul.f32 %v3923_v36, %v2091_v17  ;;  %v2115_v11 = vmul.f32 %v3923_v36, %v2092_v60  ;;  %v4068_v54 = vmax.f32 %v3869_v47, %v3867_v40 }
 0x161   :  { %v2040_v50 = vmax.f32 %v1814_v14, %v2001_v25  ;;  %v2057_v57 = vadd.f32 %v2041_v2, %v227_v48  ;;  %v1785_v27 = vpop.f32.mrb[69].mxu1  ;;  %v2011_v61 = vpop.f32.mrb[69].mxu0  ;;  %v2094_v53 = vmax.f32 %v2078_v49, 0.0  ;;  %v4069_v35 = vmax.f32 %v3873_v0, %v3871_v56 }
 0x162   :  { %v1817_v21 = vmax.f32 %v4068_v54, %v2921_v24  ;;  %v2142_v18 = vsel %vm56_vm0, %v2114_v44, 0.0  ;;  %v2093_v33 = vmax.f32 %v2077_v4, 0.0  ;;  %v232_v1 = vadd.f32 %v3894_v13, %v3666_v5 }
 0x163   :  { %v2056_v45 = vadd.f32 %v2040_v50, %v222_v58  ;;  %v1816_v31 = vmax.f32 %v4069_v35, %v1785_v27  ;;  %v2080_v52 = vadd.f32 %v3906_v34, %v2057_v57  ;;  %2140 = vadd.xlane.f32.xlu1 %v2139_v63  ;;  %2143 = vadd.xlane.f32.xlu0 %v2142_v18  ;;  %v2145_v38 = vsel %vm56_vm0, %v2115_v11, 0.0 }
 0x164   :  { %v2043_v40 = vmax.f32 %v1817_v21, %v2947_v29  ;;  %v2924_v16 = vpop.f32.mrb[70].mxu1  ;;  %v2950_v37 = vpop.f32.mrb[70].mxu0  ;;  %v2116_v56 = vmul.f32 %v3923_v36, %v2093_v33  ;;  %v4070_v55 = vmax.f32 %v3881_v15, %v3879_v6  ;;  %v2117_v59 = vmul.f32 %v3923_v36, %v2094_v53  ;;  %v4031_v29 = vld [vmem:[#allocation2] ss:$0 sm:$0xff] }
 0x165   :  { %v2079_v47 = vadd.f32 %v3906_v34, %v2056_v45  ;;  %v2042_v8 = vmax.f32 %v1816_v31, %v2011_v61  ;;  %v1795_v5 = vpop.f32.mrb[71].mxu1  ;;  %v2021_v58 = vpop.f32.mrb[71].mxu0  ;;  %v2096_v19 = vmax.f32 %v2080_v52, 0.0  ;;  %v4071_v41 = vmax.f32 %v3885_v7, %v3883_v10 }
 0x166   :  { %v2059_v0 = vadd.f32 %v2043_v40, %v237_v26  ;;  %v1819_v48 = vmax.f32 %v4070_v55, %v2924_v16  ;;  %v2148_v62 = vsel %vm56_vm0, %v2116_v56, 0.0  ;;  %v247_v22 = vadd.f32 %v3670_v30, %v3894_v13 }
 0x167   :  { %v2058_v20 = vadd.f32 %v2042_v8, %v232_v1  ;;  %v1818_v39 = vmax.f32 %v4071_v41, %v1795_v5  ;;  %v2095_v51 = vmax.f32 %v2079_v47, 0.0  ;;  %2146 = vadd.xlane.f32.xlu1 %v2145_v38  ;;  %2149 = vadd.xlane.f32.xlu0 %v2148_v62  ;;  %v242_v6 = vadd.f32 %v3894_v13, %v3674_v32 }
 0x168   :  { %v2082_v28 = vadd.f32 %v3906_v34, %v2059_v0  ;;  %v2045_v15 = vmax.f32 %v1819_v48, %v2950_v37  ;;  %v2151_v9 = vsel %vm56_vm0, %v2117_v59, 0.0  ;;  %v2119_v25 = vmul.f32 %v3923_v36, %v2096_v19 }
 0x169   :  { %v2081_v23 = vadd.f32 %v3906_v34, %v2058_v20  ;;  %v2044_v3 = vmax.f32 %v1818_v39, %v2021_v58  ;;  %v2118_v10 = vmul.f32 %v3923_v36, %v2095_v51 }
 0x16a   :  { %v2061_v7 = vadd.f32 %v2045_v15, %v247_v22  ;;  %v2098_v42 = vmax.f32 %v2082_v28, 0.0  ;;  %v2157_v14 = vsel %vm56_vm0, %v2119_v25, 0.0 }
 0x16b   :  { %v2060_v43 = vadd.f32 %v2044_v3, %v242_v6  ;;  %v2154_v30 = vsel %vm56_vm0, %v2118_v10, 0.0  ;;  %v2097_v60 = vmax.f32 %v2081_v23, 0.0  ;;  %2152 = vadd.xlane.f32.xlu1 %v2151_v9 }
 0x16c   :  { %v2084_v12 = vadd.f32 %v3906_v34, %v2061_v7  ;;  %2155 = vadd.xlane.f32.xlu0 %v2154_v30  ;;  %v2121_v17 = vmul.f32 %v3923_v36, %v2098_v42 }
 0x16d   :  { %v2083_v32 = vadd.f32 %v3906_v34, %v2060_v43  ;;  %v2120_v13 = vmul.f32 %v3923_v36, %v2097_v60 }
 0x16e   :  { %v2100_v49 = vmax.f32 %v2084_v12, 0.0  ;;  %v2163_v4 = vsel %vm56_vm0, %v2121_v17, 0.0 }
 0x16f   :  { %v2160_v46 = vsel %vm56_vm0, %v2120_v13, 0.0  ;;  %v2099_v26 = vmax.f32 %v2083_v32, 0.0  ;;  %2158 = vadd.xlane.f32.xlu1 %v2157_v14 }
 0x170   :  { %2161 = vadd.xlane.f32.xlu0 %v2160_v46  ;;  %v2123_v34 = vmul.f32 %v3923_v36, %v2100_v49 }
 0x171   :  { %v2122_v2 = vmul.f32 %v3923_v36, %v2099_v26 }
 0x172   :  { %v2169_v24 = vsel %vm56_vm0, %v2123_v34, 0.0 }
 0x173   :  { %v2166_v50 = vsel %vm56_vm0, %v2122_v2, 0.0  ;;  %2164 = vadd.xlane.f32.xlu1 %v2163_v4 }
 0x174   :  { %2167 = vadd.xlane.f32.xlu0 %v2166_v50 }
 0x177   :  { %2170 = vadd.xlane.f32.xlu1 %v2169_v24 }
 0x1e3   :  { %v2129_v44 = vpop.xlane.xlu0 %2128 }
 0x1e4   :  { %v2180_v11 = vadd.f32 %v4031_v29, %v2129_v44 }
 0x1e6   :  { %v2196_v57 = vmul.f32 0.5, %v2180_v11 }
 0x1e7   :  { %v2126_v54 = vpop.xlane.xlu0 %2125 }
 0x1e8   :  { %v2179_v21 = vadd.f32 %v4031_v29, %v2126_v54  ;;  %v2132_v27 = vpop.xlane.xlu1 %2131  ;;  %2953 = vtanh.f32 %v2196_v57 }
 0x1e9   :  { %v2181_v61 = vadd.f32 %v4031_v29, %v2132_v27 }
 0x1ea   :  { %v2195_v63 = vmul.f32 0.5, %v2179_v21 }
 0x1eb   :  { %v2197_v36 = vmul.f32 0.5, %v2181_v61 }
 0x1ec   :  { %2955 = vtanh.f32 %v2195_v63  ;;  %v2135_v53 = vpop.xlane.xlu1 %2134  ;;  %v2138_v35 = vpop.xlane.xlu0 %2137 }
 0x1ed   :  { %v2182_v45 = vadd.f32 %v4031_v29, %v2135_v53  ;;  %2957 = vtanh.f32 %v2197_v36  ;;  %v2183_v18 = vadd.f32 %v4031_v29, %v2138_v35 }
 0x1ef   :  { %v2198_v31 = vmul.f32 0.5, %v2182_v45  ;;  %v2199_v1 = vmul.f32 0.5, %v2183_v18 }
 0x1f0   :  { %v2141_v33 = vpop.xlane.xlu1 %2140  ;;  %v2144_v47 = vpop.xlane.xlu0 %2143 }
 0x1f1   :  { %2959 = vtanh.f32 %v2198_v31  ;;  %v2184_v52 = vadd.f32 %v4031_v29, %v2141_v33  ;;  %v2185_v38 = vadd.f32 %v4031_v29, %v2144_v47 }
 0x1f2   :  { %v2954_v40 = vpop.eup %2953  ;;  %2961 = vtanh.f32 %v2199_v1 }
 0x1f3   :  { %v2200_v37 = vmul.f32 0.5, %v2184_v52  ;;  %v2228_v56 = vmul.f32 0.5, %v2954_v40  ;;  %v2201_v5 = vmul.f32 0.5, %v2185_v38 }
 0x1f4   :  { %v2147_v0 = vpop.xlane.xlu1 %2146  ;;  %v2150_v19 = vpop.xlane.xlu0 %2149 }
 0x1f5   :  { %2963 = vtanh.f32 %v2200_v37  ;;  %v2186_v58 = vadd.f32 %v4031_v29, %v2147_v0  ;;  %v2244_v20 = vadd.f32 0.5, %v2228_v56  ;;  %v2187_v62 = vadd.f32 %v4031_v29, %v2150_v19 }
 0x1f6   :  { %v2956_v8 = vpop.eup %2955  ;;  %2965 = vtanh.f32 %v2201_v5 }
 0x1f7   :  { %v2227_v16 = vmul.f32 0.5, %v2956_v8  ;;  %v2958_v48 = vpop.eup %2957  ;;  %v2202_v39 = vmul.f32 0.5, %v2186_v58  ;;  %v2203_v6 = vmul.f32 0.5, %v2187_v62 }
 0x1f8   :  { %v2229_v59 = vmul.f32 0.5, %v2958_v48  ;;  %v2153_v22 = vpop.xlane.xlu1 %2152 }
 0x1f9   :  { %v2243_v55 = vadd.f32 0.5, %v2227_v16  ;;  %2967 = vtanh.f32 %v2202_v39  ;;  %v2188_v23 = vadd.f32 %v4031_v29, %v2153_v22  ;;  %v2156_v10 = vpop.xlane.xlu0 %2155 }
 0x1fa   :  { %v2245_v28 = vadd.f32 0.5, %v2229_v59  ;;  %2969 = vtanh.f32 %v2203_v6  ;;  %v2189_v43 = vadd.f32 %v4031_v29, %v2156_v10 }
 0x1fb   :  { %2259 = vxpose.xlu0.b32.start [1/16] (narrow) %v2243_v55, 8  ;;  %v2960_v41 = vpop.eup %2959  ;;  %v2204_v25 = vmul.f32 0.5, %v2188_v23 }
 0x1fc   :  { %v2230_v51 = vmul.f32 0.5, %v2960_v41  ;;  %v2962_v15 = vpop.eup %2961  ;;  %v2159_v60 = vpop.xlane.xlu1 %2158  ;;  %v2205_v32 = vmul.f32 0.5, %v2189_v43 }
 0x1fd   :  { %v2231_v3 = vmul.f32 0.5, %v2962_v15  ;;  %2971 = vtanh.f32 %v2204_v25  ;;  %v2190_v13 = vadd.f32 %v4031_v29, %v2159_v60  ;;  %v2162_v46 = vpop.xlane.xlu0 %2161 }
 0x1fe   :  { %v2246_v7 = vadd.f32 0.5, %v2230_v51  ;;  %2973 = vtanh.f32 %v2205_v32  ;;  %v2191_v2 = vadd.f32 %v4031_v29, %v2162_v46 }
 0x1ff   :  { %2260 = vxpose.xlu0.b32.cont [2/16] (narrow) %v2244_v20, 8  ;;  %v2964_v9 = vpop.eup %2963  ;;  %v2247_v42 = vadd.f32 0.5, %v2231_v3  ;;  %v2206_v49 = vmul.f32 0.5, %v2190_v13 }
 0x200   :  { %v2232_v30 = vmul.f32 0.5, %v2964_v9  ;;  %v2966_v12 = vpop.eup %2965  ;;  %v2165_v50 = vpop.xlane.xlu1 %2164  ;;  %v2207_v44 = vmul.f32 0.5, %v2191_v2 }
 0x201   :  { %v2233_v14 = vmul.f32 0.5, %v2966_v12  ;;  %2975 = vtanh.f32 %v2206_v49  ;;  %v2192_v11 = vadd.f32 %v4031_v29, %v2165_v50  ;;  %v2168_v54 = vpop.xlane.xlu0 %2167 }
 0x202   :  { %v2248_v17 = vadd.f32 0.5, %v2232_v30  ;;  %2977 = vtanh.f32 %v2207_v44  ;;  %v2193_v63 = vadd.f32 %v4031_v29, %v2168_v54 }
 0x203   :  { %2261 = vxpose.xlu0.b32.cont [3/16] (narrow) %v2245_v28, 8  ;;  %v2968_v26 = vpop.eup %2967  ;;  %v2249_v34 = vadd.f32 0.5, %v2233_v14  ;;  %v2208_v61 = vmul.f32 0.5, %v2192_v11 }
 0x204   :  { %v2234_v4 = vmul.f32 0.5, %v2968_v26  ;;  %v2970_v24 = vpop.eup %2969  ;;  %v2171_v53 = vpop.xlane.xlu1 %2170  ;;  %v2209_v31 = vmul.f32 0.5, %v2193_v63 }
 0x205   :  { %v2235_v57 = vmul.f32 0.5, %v2970_v24  ;;  %2979 = vtanh.f32 %v2208_v61  ;;  %v2194_v18 = vadd.f32 %v4031_v29, %v2171_v53 }
 0x206   :  { %v2250_v21 = vadd.f32 0.5, %v2234_v4  ;;  %2981 = vtanh.f32 %v2209_v31 }
 0x207   :  { %2262 = vxpose.xlu0.b32.cont [4/16] (narrow) %v2246_v7, 8  ;;  %v2972_v27 = vpop.eup %2971  ;;  %v2251_v45 = vadd.f32 0.5, %v2235_v57  ;;  %v2210_v40 = vmul.f32 0.5, %v2194_v18 }
 0x208   :  { %v2236_v36 = vmul.f32 0.5, %v2972_v27  ;;  %v2974_v35 = vpop.eup %2973 }
 0x209   :  { %v2237_v33 = vmul.f32 0.5, %v2974_v35  ;;  %2983 = vtanh.f32 %v2210_v40 }
 0x20a   :  { %v2252_v1 = vadd.f32 0.5, %v2236_v36 }
 0x20b   :  { %2263 = vxpose.xlu0.b32.cont [5/16] (narrow) %v2247_v42, 8  ;;  %v2976_v52 = vpop.eup %2975  ;;  %v2253_v8 = vadd.f32 0.5, %v2237_v33 }
 0x20c   :  { %v2238_v47 = vmul.f32 0.5, %v2976_v52  ;;  %v2978_v16 = vpop.eup %2977 }
 0x20d   :  { %v2239_v37 = vmul.f32 0.5, %v2978_v16 }
 0x20e   :  { %v2254_v38 = vadd.f32 0.5, %v2238_v47 }
 0x20f   :  { %2264 = vxpose.xlu0.b32.cont [6/16] (narrow) %v2248_v17, 8  ;;  %v2980_v56 = vpop.eup %2979  ;;  %v2255_v55 = vadd.f32 0.5, %v2239_v37 }
 0x210   :  { %v2240_v0 = vmul.f32 0.5, %v2980_v56  ;;  %v2982_v48 = vpop.eup %2981 }
 0x211   :  { %v2241_v29 = vmul.f32 0.5, %v2982_v48 }
 0x212   :  { %v2256_v5 = vadd.f32 0.5, %v2240_v0 }
 0x213   :  { %2265 = vxpose.xlu0.b32.cont [7/16] (narrow) %v2249_v34, 8  ;;  %v2984_v58 = vpop.eup %2983  ;;  %v2257_v19 = vadd.f32 0.5, %v2241_v29 }
 0x214   :  { %v2242_v59 = vmul.f32 0.5, %v2984_v58 }
 0x216   :  { %v2258_v20 = vadd.f32 0.5, %v2242_v59 }
 0x217   :  { %2266 = vxpose.xlu0.b32.cont [8/16] (narrow) %v2250_v21, 8 }
 0x21b   :  { %2267 = vxpose.xlu0.b32.cont [9/16] (narrow) %v2251_v45, 8 }
 0x21f   :  { %2268 = vxpose.xlu0.b32.cont [10/16] (narrow) %v2252_v1, 8 }
 0x223   :  { %2269 = vxpose.xlu0.b32.cont [11/16] (narrow) %v2253_v8, 8 }
 0x227   :  { %2270 = vxpose.xlu0.b32.cont [12/16] (narrow) %v2254_v38, 8 }
 0x22b   :  { %2271 = vxpose.xlu0.b32.cont [13/16] (narrow) %v2255_v55, 8 }
 0x22f   :  { %2272 = vxpose.xlu0.b32.cont [14/16] (narrow) %v2256_v5, 8 }
 0x233   :  { %2273 = vxpose.xlu0.b32.cont [15/16] (narrow) %v2257_v19, 8 }
 0x237   :  { %2274 = vxpose.xlu0.b32.end [16/16] (narrow) %v2258_v20, 8 }
 0x27b   :  { %v2275_v41 = vpop.trf.xlu0 }
 0x27c   :  { %2291 = vst [vmem:[%s4060_s8] sm:$0x1] %v2275_v41 }

</bundles_post_ra>
